<compile_context>
chip_gen: v7x
topology: tpu7x:2x2x1
jax: 0.10.0
libtpu: 0.0.40
codegen_flags: <defaults>
</compile_context>

<pallas_src>
import jax
import jax.numpy as jnp
from jax.experimental import pallas as pl
from jax.experimental.pallas import tpu as pltpu

_LANE = 128
_SUBLANE = 8

_PARAM_ORDER = ("w1x", "w1t", "b1", "w2", "b2", "w3", "b3", "w4", "b4", "w5", "b5")


def _round_up(x, m):
    return (x + m - 1) // m * m


def _silu(z):
    # SiLU(x) = x * sigmoid(x); sigmoid lowers to the EUP logistic path.
    return z * jax.nn.sigmoid(z)


def vector_field_kernel(t_ref, x_ref,
                        w1x_ref, w1t_ref, b1_ref,
                        w2_ref, b2_ref,
                        w3_ref, b3_ref,
                        w4_ref, b4_ref,
                        w5_ref, b5_ref,
                        out_ref):
    """Fused (Linear+SiLU) x4 -> Linear on one batch tile.

    x_ref is bf16 (direct MXU operand); accumulation is f32; bias add + SiLU
    stay f32; activations stay resident in vregs/VMEM between layers.
    """
    x = x_ref[...]          # (TB, D_in_pad) bf16
    t = t_ref[...]          # (TB, 1) f32

    # Layer 1 as x @ W1[1:] + t * W1[0:1] + b1 (keeps K 128-aligned, no concat).
    h = jnp.dot(x, w1x_ref[...], preferred_element_type=jnp.float32)
    h = _silu(h + t * w1t_ref[...] + b1_ref[...])

    h = _silu(jnp.dot(h.astype(jnp.bfloat16), w2_ref[...],
                      preferred_element_type=jnp.float32) + b2_ref[...])
    h = _silu(jnp.dot(h.astype(jnp.bfloat16), w3_ref[...],
                      preferred_element_type=jnp.float32) + b3_ref[...])
    h = _silu(jnp.dot(h.astype(jnp.bfloat16), w4_ref[...],
                      preferred_element_type=jnp.float32) + b4_ref[...])

    out = jnp.dot(h.astype(jnp.bfloat16), w5_ref[...],
                  preferred_element_type=jnp.float32) + b5_ref[...]
    out_ref[...] = out.astype(out_ref.dtype)


def init_params(key, image_dim, hidden_dim=128):
    """Init matching nn.Linear (uniform +-1/sqrt(fan_in)), laid out for TPU.

    Weights are transposed to (in, out), zero-padded so every feature dim is a
    multiple of 128 lanes, and stored in bf16 (MXU operand dtype).  Biases
    stay f32.  Layer 1's weight is split into a time row (w1t, f32) and an
    image block (w1x, bf16).
    """
    dims = [
        (image_dim + 1, hidden_dim // 2),    # enc1
        (hidden_dim // 2, hidden_dim // 4),  # enc2
        (hidden_dim // 4, hidden_dim // 2),  # dec1
        (hidden_dim // 2, hidden_dim),       # dec2
        (hidden_dim, image_dim),             # final
    ]
    raw = []
    for fan_in, fan_out in dims:
        key, kw, kb = jax.random.split(key, 3)
        bound = 1.0 / float(fan_in) ** 0.5
        w = jax.random.uniform(kw, (fan_in, fan_out), jnp.float32, -bound, bound)
        b = jax.random.uniform(kb, (fan_out,), jnp.float32, -bound, bound)
        raw.append((w, b))

    def pad_to(a, rows, cols):
        return jnp.pad(a, ((0, rows - a.shape[0]), (0, cols - a.shape[1])))

    # Keep hidden widths at 128-lane padding (don't blow up to 256: the kernel
    # is memory-bound, bigger MXU tiles add DMA/VMEM cost with no useful FLOPs).
    d_in_p = _round_up(image_dim, _LANE)
    h1_p = _round_up(hidden_dim // 2, _LANE)
    h2_p = _round_up(hidden_dim // 4, _LANE)
    h3_p = _round_up(hidden_dim // 2, _LANE)
    h4_p = _round_up(hidden_dim, _LANE)
    d_out_p = _round_up(image_dim, _LANE)

    (w1, b1), (w2, b2), (w3, b3), (w4, b4), (w5, b5) = raw

    return {
        "w1t": pad_to(w1[0:1, :], 1, h1_p),                            # f32
        "w1x": pad_to(w1[1:, :], d_in_p, h1_p).astype(jnp.bfloat16),
        "b1": pad_to(b1[None, :], 1, h1_p),
        "w2": pad_to(w2, h1_p, h2_p).astype(jnp.bfloat16),
        "b2": pad_to(b2[None, :], 1, h2_p),
        "w3": pad_to(w3, h2_p, h3_p).astype(jnp.bfloat16),
        "b3": pad_to(b3[None, :], 1, h3_p),
        "w4": pad_to(w4, h3_p, h4_p).astype(jnp.bfloat16),
        "b4": pad_to(b4[None, :], 1, h4_p),
        "w5": pad_to(w5, h4_p, d_out_p).astype(jnp.bfloat16),
        "b5": pad_to(b5[None, :], 1, d_out_p),
    }


def _vmem_budget_bytes():
    """0.7 x per-TensorCore VMEM capacity, clamped per generation."""
    kind = ""
    try:
        kind = jax.devices()[0].device_kind.lower()
    except Exception:
        pass
    if "7" in kind:                       # v7x: 64 MiB per TensorCore
        cap = 64 << 20
    elif "v5" in kind or "v6" in kind:    # v5e / v6e: 128 MiB
        cap = 128 << 20
    else:
        cap = None
    reported = 0
    try:
        reported = int(getattr(pltpu.get_tpu_info(), "vmem_capacity_bytes", 0))
    except Exception:
        reported = 0
    if cap is None:
        cap = reported if reported else (64 << 20)   # conservative default
    elif reported:
        cap = min(cap, reported)  # guard against per-chip (not per-core) reports
    return int(cap * 0.7)


def vector_field_forward(t, x, params):
    """JAX/Pallas equivalent of VectorField.forward(t, x) (eval mode)."""
    batch = x.shape[0]
    x_flat = x.reshape(batch, -1)
    image_dim = x_flat.shape[1]

    d_in_p = params["w1x"].shape[0]
    d_out_p = params["b5"].shape[1]
    h_max_p = max(params[k].shape[1] for k in ("b1", "b2", "b3", "b4"))

    out_dtype = jnp.bfloat16 if x.dtype == jnp.bfloat16 else jnp.float32
    out_itemsize = jnp.dtype(out_dtype).itemsize

    # --- batch tile from the per-TensorCore VMEM budget ----------------------
    weight_bytes = sum(int(params[k].size) * params[k].dtype.itemsize
                       for k in _PARAM_ORDER)
    # Per-row bytes: double-buffered bf16 input + output tiles, the t column,
    # live f32 activations (current + next layer) and the bf16 staging copy of
    # the widest hidden activation.
    per_row = (2 * 2 * d_in_p
               + 2 * out_itemsize * d_out_p
               + 2 * 4
               + 2 * 4 * h_max_p
               + 2 * h_max_p)
    vmem_budget = _vmem_budget_bytes()

    tb = _SUBLANE
    for cand in (1024, 512, 256, 128, 64, 32, 16, 8):
        # Conservatively assume default double-buffered weights (2x) even
        # though we request single-buffering below.
        if 2 * weight_bytes + cand * per_row <= vmem_budget:
            tb = cand
            break

    # Keep >= ~4 grid steps when the batch allows it so the batch axis can be
    # pipelined (DMA/compute overlap) and sharded across v7x's two TensorCores.
    b8 = _round_up(batch, _SUBLANE)
    tb_cap = max(_SUBLANE, (b8 // 4) // _SUBLANE * _SUBLANE)
    tb = min(tb, b8, tb_cap)
    b_pad = _round_up(batch, tb)

    # --- prepare inputs (skip pad copies when already aligned) ---------------
    t_flat = t.reshape(-1).astype(jnp.float32)
    if b_pad != batch:
        t_col = jnp.zeros((b_pad, 1), jnp.float32).at[:batch, 0].set(t_flat)
    else:
        t_col = t_flat.reshape(batch, 1)

    if b_pad != batch or d_in_p != image_dim:
        # Fuse the bf16 cast into the pad so the extra copy is half-size.
        x_in = jnp.zeros((b_pad, d_in_p), jnp.bfloat16).at[:batch, :image_dim].set(
            x_flat.astype(jnp.bfloat16))
    else:
        x_in = x_flat.astype(jnp.bfloat16)

    args = (t_col, x_in) + tuple(params[k] for k in _PARAM_ORDER)

    def _build_call(single_buffer_weights):
        def _row_spec(width):
            return pl.BlockSpec((tb, width), lambda i: (i, 0))

        if single_buffer_weights:
            def _const_spec(shape):
                # Constant index_map -> weights stay resident; one buffer is
                # enough, freeing VMEM for bigger activation tiles.
                return pl.BlockSpec(shape, lambda i: (0, 0),
                                    pipeline_mode=pl.Buffered(1))
        else:
            def _const_spec(shape):
                return pl.BlockSpec(shape, lambda i: (0, 0))

        # TODO(synk): if profiling shows the width-1 t DMA matters, move t to
        # SMEM via PrefetchScalarGridSpec.
        in_specs = [_row_spec(1), _row_spec(d_in_p)]
        in_specs += [_const_spec(params[k].shape) for k in _PARAM_ORDER]

        return pl.pallas_call(
            vector_field_kernel,
            out_shape=jax.ShapeDtypeStruct((b_pad, d_out_p), out_dtype),
            grid=(b_pad // tb,),
            in_specs=in_specs,
            out_specs=_row_spec(d_out_p),
            compiler_params=pltpu.CompilerParams(
                dimension_semantics=("parallel",),
                vmem_limit_bytes=vmem_budget,
            ),
        )

    try:
        out_flat = _build_call(True)(*args)
    except Exception:
        # Fallback if this Pallas build rejects pipeline_mode / Buffered(1);
        # the VMEM estimate already assumes 2x weights, so this is safe.
        out_flat = _build_call(False)(*args)

    if b_pad != batch or d_out_p != image_dim:
        out_flat = out_flat[:batch, :image_dim]
    return out_flat.reshape(x.shape).astype(x.dtype)


def vector_field_reference(t, x, params):
    """Pure-JAX reference using the same bf16-operand / f32-accum math."""
    batch = x.shape[0]
    x_flat = x.reshape(batch, -1)
    image_dim = x_flat.shape[1]
    x_b = x_flat.astype(jnp.bfloat16)
    t_col = t.reshape(-1, 1).astype(jnp.float32)

    h = jnp.dot(x_b, params["w1x"][:image_dim],
                preferred_element_type=jnp.float32)
    h = _silu(h + t_col * params["w1t"] + params["b1"])
    for wk, bk in (("w2", "b2"), ("w3", "b3"), ("w4", "b4")):
        h = _silu(jnp.dot(h.astype(jnp.bfloat16), params[wk],
                          preferred_element_type=jnp.float32) + params[bk])
    out = jnp.dot(h.astype(jnp.bfloat16), params["w5"],
                  preferred_element_type=jnp.float32) + params["b5"]
    return out[:, :image_dim].reshape(x.shape).astype(x.dtype)


if __name__ == "__main__":
    key = jax.random.PRNGKey(0)

    # Two small cases: one with image_dim already 128-aligned (1024), one that
    # exercises feature/batch padding (image_dim=16, odd batch).
    for (B, C, H, W, hidden) in ((2, 4, 16, 16, 32), (3, 1, 4, 4, 32)):
        key, k_params, k_x, k_t = jax.random.split(key, 4)
        image_dim = C * H * W

        x = jax.random.normal(k_x, (B, C, H, W), jnp.float32)
        t = jax.random.uniform(k_t, (B,), jnp.float32)
        params = init_params(k_params, image_dim, hidden)

        out = jax.block_until_ready(vector_field_forward(t, x, params))
        ref = vector_field_reference(t, x, params)

        assert out.shape == x.shape
        assert jnp.allclose(out, ref, atol=2e-3, rtol=2e-3), (
            f"mismatch vs reference for shape {(B, C, H, W)}")

    print("KERNEL_OK")
</pallas_src>

<mosaic_0001>
module attributes {stable_mosaic.version = 11 : i64} {
  func.func @vector_field_kernel(%arg0: i32, %arg1: memref<8x1xf32, #tpu.memory_space<vmem>>, %arg2: memref<8x1024xbf16, #tpu.memory_space<vmem>>, %arg3: memref<1024x128xbf16, #tpu.memory_space<vmem>>, %arg4: memref<1x128xf32, #tpu.memory_space<vmem>>, %arg5: memref<1x128xf32, #tpu.memory_space<vmem>>, %arg6: memref<128x128xbf16, #tpu.memory_space<vmem>>, %arg7: memref<1x128xf32, #tpu.memory_space<vmem>>, %arg8: memref<128x128xbf16, #tpu.memory_space<vmem>>, %arg9: memref<1x128xf32, #tpu.memory_space<vmem>>, %arg10: memref<128x128xbf16, #tpu.memory_space<vmem>>, %arg11: memref<1x128xf32, #tpu.memory_space<vmem>>, %arg12: memref<128x1024xbf16, #tpu.memory_space<vmem>>, %arg13: memref<1x1024xf32, #tpu.memory_space<vmem>>, %arg14: memref<8x1024xf32, #tpu.memory_space<vmem>>) attributes {dimension_semantics = [#tpu.dimension_semantics<parallel>], iteration_bounds = array<i64: 1>, scalar_prefetch = 0 : i64, scratch_operands = 0 : i64, tpu.core_type = #tpu.core_type<tc>, window_params = [{transform_indices = @transform_0, window_bounds = array<i64: 8, 1>}, {transform_indices = @transform_1, window_bounds = array<i64: 8, 1024>}, {pipeline_mode = #tpu.pipeline_mode<synchronous>, transform_indices = @transform_2, window_bounds = array<i64: 1024, 128>}, {pipeline_mode = #tpu.pipeline_mode<synchronous>, transform_indices = @transform_3, window_bounds = array<i64: 1, 128>}, {pipeline_mode = #tpu.pipeline_mode<synchronous>, transform_indices = @transform_4, window_bounds = array<i64: 1, 128>}, {pipeline_mode = #tpu.pipeline_mode<synchronous>, transform_indices = @transform_5, window_bounds = array<i64: 128, 128>}, {pipeline_mode = #tpu.pipeline_mode<synchronous>, transform_indices = @transform_6, window_bounds = array<i64: 1, 128>}, {pipeline_mode = #tpu.pipeline_mode<synchronous>, transform_indices = @transform_7, window_bounds = array<i64: 128, 128>}, {pipeline_mode = #tpu.pipeline_mode<synchronous>, transform_indices = @transform_8, window_bounds = array<i64: 1, 128>}, {pipeline_mode = #tpu.pipeline_mode<synchronous>, transform_indices = @transform_9, window_bounds = array<i64: 128, 128>}, {pipeline_mode = #tpu.pipeline_mode<synchronous>, transform_indices = @transform_10, window_bounds = array<i64: 1, 128>}, {pipeline_mode = #tpu.pipeline_mode<synchronous>, transform_indices = @transform_11, window_bounds = array<i64: 128, 1024>}, {pipeline_mode = #tpu.pipeline_mode<synchronous>, transform_indices = @transform_12, window_bounds = array<i64: 1, 1024>}, {transform_indices = @transform_13, window_bounds = array<i64: 8, 1024>}]} {
    %c0 = arith.constant 0 : index
    %c0_0 = arith.constant 0 : index
    %0 = vector.load %arg2[%c0, %c0_0] : memref<8x1024xbf16, #tpu.memory_space<vmem>>, vector<8x1024xbf16>
    %c0_1 = arith.constant 0 : index
    %c0_2 = arith.constant 0 : index
    %1 = vector.load %arg1[%c0_1, %c0_2] : memref<8x1xf32, #tpu.memory_space<vmem>>, vector<8x1xf32>
    %c0_3 = arith.constant 0 : index
    %c0_4 = arith.constant 0 : index
    %2 = vector.load %arg3[%c0_3, %c0_4] : memref<1024x128xbf16, #tpu.memory_space<vmem>>, vector<1024x128xbf16>
    %cst = arith.constant dense<0.000000e+00> : vector<8x128xf32>
    %3 = tpu.matmul %0, %2, %cst {dimension_numbers = #tpu.dot_dimension_numbers<[1], [0], [0], [1], [0, 0, 1, 1], [], []>} : vector<8x1024xbf16>, vector<1024x128xbf16>, vector<8x128xf32> -> vector<8x128xf32>
    %c0_5 = arith.constant 0 : index
    %c0_6 = arith.constant 0 : index
    %4 = vector.load %arg4[%c0_5, %c0_6] : memref<1x128xf32, #tpu.memory_space<vmem>>, vector<1x128xf32>
    %5 = vector.broadcast %1 : vector<8x1xf32> to vector<8x128xf32>
    %6 = vector.broadcast %4 : vector<1x128xf32> to vector<8x128xf32>
    %7 = arith.mulf %5, %6 : vector<8x128xf32>
    %8 = arith.addf %3, %7 : vector<8x128xf32>
    %c0_7 = arith.constant 0 : index
    %c0_8 = arith.constant 0 : index
    %9 = vector.load %arg5[%c0_7, %c0_8] : memref<1x128xf32, #tpu.memory_space<vmem>>, vector<1x128xf32>
    %10 = vector.broadcast %9 : vector<1x128xf32> to vector<8x128xf32>
    %11 = arith.addf %8, %10 : vector<8x128xf32>
    %12 = arith.negf %11 : vector<8x128xf32>
    %13 = math.exp %12 : vector<8x128xf32>
    %cst_9 = arith.constant 1.000000e+00 : f32
    %14 = vector.broadcast %cst_9 : f32 to vector<8x128xf32>
    %15 = arith.addf %14, %13 : vector<8x128xf32>
    %16 = arith.divf %14, %15 : vector<8x128xf32>
    %17 = arith.mulf %11, %16 : vector<8x128xf32>
    %18 = arith.truncf %17 : vector<8x128xf32> to vector<8x128xbf16>
    %c0_10 = arith.constant 0 : index
    %c0_11 = arith.constant 0 : index
    %19 = vector.load %arg6[%c0_10, %c0_11] : memref<128x128xbf16, #tpu.memory_space<vmem>>, vector<128x128xbf16>
    %cst_12 = arith.constant dense<0.000000e+00> : vector<8x128xf32>
    %20 = tpu.matmul %18, %19, %cst_12 {dimension_numbers = #tpu.dot_dimension_numbers<[1], [0], [0], [1], [0, 0, 1, 1], [], []>} : vector<8x128xbf16>, vector<128x128xbf16>, vector<8x128xf32> -> vector<8x128xf32>
    %c0_13 = arith.constant 0 : index
    %c0_14 = arith.constant 0 : index
    %21 = vector.load %arg7[%c0_13, %c0_14] : memref<1x128xf32, #tpu.memory_space<vmem>>, vector<1x128xf32>
    %22 = vector.broadcast %21 : vector<1x128xf32> to vector<8x128xf32>
    %23 = arith.addf %20, %22 : vector<8x128xf32>
    %24 = arith.negf %23 : vector<8x128xf32>
    %25 = math.exp %24 : vector<8x128xf32>
    %cst_15 = arith.constant 1.000000e+00 : f32
    %26 = vector.broadcast %cst_15 : f32 to vector<8x128xf32>
    %27 = arith.addf %26, %25 : vector<8x128xf32>
    %28 = arith.divf %26, %27 : vector<8x128xf32>
    %29 = arith.mulf %23, %28 : vector<8x128xf32>
    %30 = arith.truncf %29 : vector<8x128xf32> to vector<8x128xbf16>
    %c0_16 = arith.constant 0 : index
    %c0_17 = arith.constant 0 : index
    %31 = vector.load %arg8[%c0_16, %c0_17] : memref<128x128xbf16, #tpu.memory_space<vmem>>, vector<128x128xbf16>
    %cst_18 = arith.constant dense<0.000000e+00> : vector<8x128xf32>
    %32 = tpu.matmul %30, %31, %cst_18 {dimension_numbers = #tpu.dot_dimension_numbers<[1], [0], [0], [1], [0, 0, 1, 1], [], []>} : vector<8x128xbf16>, vector<128x128xbf16>, vector<8x128xf32> -> vector<8x128xf32>
    %c0_19 = arith.constant 0 : index
    %c0_20 = arith.constant 0 : index
    %33 = vector.load %arg9[%c0_19, %c0_20] : memref<1x128xf32, #tpu.memory_space<vmem>>, vector<1x128xf32>
    %34 = vector.broadcast %33 : vector<1x128xf32> to vector<8x128xf32>
    %35 = arith.addf %32, %34 : vector<8x128xf32>
    %36 = arith.negf %35 : vector<8x128xf32>
    %37 = math.exp %36 : vector<8x128xf32>
    %cst_21 = arith.constant 1.000000e+00 : f32
    %38 = vector.broadcast %cst_21 : f32 to vector<8x128xf32>
    %39 = arith.addf %38, %37 : vector<8x128xf32>
    %40 = arith.divf %38, %39 : vector<8x128xf32>
    %41 = arith.mulf %35, %40 : vector<8x128xf32>
    %42 = arith.truncf %41 : vector<8x128xf32> to vector<8x128xbf16>
    %c0_22 = arith.constant 0 : index
    %c0_23 = arith.constant 0 : index
    %43 = vector.load %arg10[%c0_22, %c0_23] : memref<128x128xbf16, #tpu.memory_space<vmem>>, vector<128x128xbf16>
    %cst_24 = arith.constant dense<0.000000e+00> : vector<8x128xf32>
    %44 = tpu.matmul %42, %43, %cst_24 {dimension_numbers = #tpu.dot_dimension_numbers<[1], [0], [0], [1], [0, 0, 1, 1], [], []>} : vector<8x128xbf16>, vector<128x128xbf16>, vector<8x128xf32> -> vector<8x128xf32>
    %c0_25 = arith.constant 0 : index
    %c0_26 = arith.constant 0 : index
    %45 = vector.load %arg11[%c0_25, %c0_26] : memref<1x128xf32, #tpu.memory_space<vmem>>, vector<1x128xf32>
    %46 = vector.broadcast %45 : vector<1x128xf32> to vector<8x128xf32>
    %47 = arith.addf %44, %46 : vector<8x128xf32>
    %48 = arith.negf %47 : vector<8x128xf32>
    %49 = math.exp %48 : vector<8x128xf32>
    %cst_27 = arith.constant 1.000000e+00 : f32
    %50 = vector.broadcast %cst_27 : f32 to vector<8x128xf32>
    %51 = arith.addf %50, %49 : vector<8x128xf32>
    %52 = arith.divf %50, %51 : vector<8x128xf32>
    %53 = arith.mulf %47, %52 : vector<8x128xf32>
    %54 = arith.truncf %53 : vector<8x128xf32> to vector<8x128xbf16>
    %c0_28 = arith.constant 0 : index
    %c0_29 = arith.constant 0 : index
    %55 = vector.load %arg12[%c0_28, %c0_29] : memref<128x1024xbf16, #tpu.memory_space<vmem>>, vector<128x1024xbf16>
    %cst_30 = arith.constant dense<0.000000e+00> : vector<8x1024xf32>
    %56 = tpu.matmul %54, %55, %cst_30 {dimension_numbers = #tpu.dot_dimension_numbers<[1], [0], [0], [1], [0, 0, 1, 1], [], []>} : vector<8x128xbf16>, vector<128x1024xbf16>, vector<8x1024xf32> -> vector<8x1024xf32>
    %c0_31 = arith.constant 0 : index
    %c0_32 = arith.constant 0 : index
    %57 = vector.load %arg13[%c0_31, %c0_32] : memref<1x1024xf32, #tpu.memory_space<vmem>>, vector<1x1024xf32>
    %58 = vector.broadcast %57 : vector<1x1024xf32> to vector<8x1024xf32>
    %59 = arith.addf %56, %58 : vector<8x1024xf32>
    %c0_33 = arith.constant 0 : index
    %c0_34 = arith.constant 0 : index
    %60 = vector.load %arg14[%c0_33, %c0_34] : memref<8x1024xf32, #tpu.memory_space<vmem>>, vector<8x1024xf32>
    tpu.vector_store %arg14[%c0_33, %c0_34], %59 {strides = array<i32>} : memref<8x1024xf32, #tpu.memory_space<vmem>>, vector<8x1024xf32>,
    return
  }
  func.func @transform_0(%arg0: i32) -> (i32, i32) {
    %c0_i32 = arith.constant 0 : i32
    %c0_i32_0 = arith.constant 0 : i32
    return %arg0, %c0_i32 : i32, i32
  }
  func.func @transform_1(%arg0: i32) -> (i32, i32) {
    %c0_i32 = arith.constant 0 : i32
    %c0_i32_0 = arith.constant 0 : i32
    return %arg0, %c0_i32 : i32, i32
  }
  func.func @transform_2(%arg0: i32) -> (i32, i32) {
    %c0_i32 = arith.constant 0 : i32
    %c0_i32_0 = arith.constant 0 : i32
    %c0_i32_1 = arith.constant 0 : i32
    return %c0_i32, %c0_i32_0 : i32, i32
  }
  func.func @transform_3(%arg0: i32) -> (i32, i32) {
    %c0_i32 = arith.constant 0 : i32
    %c0_i32_0 = arith.constant 0 : i32
    %c0_i32_1 = arith.constant 0 : i32
    return %c0_i32, %c0_i32_0 : i32, i32
  }
  func.func @transform_4(%arg0: i32) -> (i32, i32) {
    %c0_i32 = arith.constant 0 : i32
    %c0_i32_0 = arith.constant 0 : i32
    %c0_i32_1 = arith.constant 0 : i32
    return %c0_i32, %c0_i32_0 : i32, i32
  }
  func.func @transform_5(%arg0: i32) -> (i32, i32) {
    %c0_i32 = arith.constant 0 : i32
    %c0_i32_0 = arith.constant 0 : i32
    %c0_i32_1 = arith.constant 0 : i32
    return %c0_i32, %c0_i32_0 : i32, i32
  }
  func.func @transform_6(%arg0: i32) -> (i32, i32) {
    %c0_i32 = arith.constant 0 : i32
    %c0_i32_0 = arith.constant 0 : i32
    %c0_i32_1 = arith.constant 0 : i32
    return %c0_i32, %c0_i32_0 : i32, i32
  }
  func.func @transform_7(%arg0: i32) -> (i32, i32) {
    %c0_i32 = arith.constant 0 : i32
    %c0_i32_0 = arith.constant 0 : i32
    %c0_i32_1 = arith.constant 0 : i32
    return %c0_i32, %c0_i32_0 : i32, i32
  }
  func.func @transform_8(%arg0: i32) -> (i32, i32) {
    %c0_i32 = arith.constant 0 : i32
    %c0_i32_0 = arith.constant 0 : i32
    %c0_i32_1 = arith.constant 0 : i32
    return %c0_i32, %c0_i32_0 : i32, i32
  }
  func.func @transform_9(%arg0: i32) -> (i32, i32) {
    %c0_i32 = arith.constant 0 : i32
    %c0_i32_0 = arith.constant 0 : i32
    %c0_i32_1 = arith.constant 0 : i32
    return %c0_i32, %c0_i32_0 : i32, i32
  }
  func.func @transform_10(%arg0: i32) -> (i32, i32) {
    %c0_i32 = arith.constant 0 : i32
    %c0_i32_0 = arith.constant 0 : i32
    %c0_i32_1 = arith.constant 0 : i32
    return %c0_i32, %c0_i32_0 : i32, i32
  }
  func.func @transform_11(%arg0: i32) -> (i32, i32) {
    %c0_i32 = arith.constant 0 : i32
    %c0_i32_0 = arith.constant 0 : i32
    %c0_i32_1 = arith.constant 0 : i32
    return %c0_i32, %c0_i32_0 : i32, i32
  }
  func.func @transform_12(%arg0: i32) -> (i32, i32) {
    %c0_i32 = arith.constant 0 : i32
    %c0_i32_0 = arith.constant 0 : i32
    %c0_i32_1 = arith.constant 0 : i32
    return %c0_i32, %c0_i32_0 : i32, i32
  }
  func.func @transform_13(%arg0: i32) -> (i32, i32) {
    %c0_i32 = arith.constant 0 : i32
    %c0_i32_0 = arith.constant 0 : i32
    return %arg0, %c0_i32 : i32, i32
  }
}

module attributes {stable_mosaic.version = 11 : i64} {
  func.func @vector_field_kernel(%arg0: i32, %arg1: memref<8x1xf32, #tpu.memory_space<vmem>>, %arg2: memref<8x1024xbf16, #tpu.memory_space<vmem>>, %arg3: memref<1024x128xbf16, #tpu.memory_space<vmem>>, %arg4: memref<1x128xf32, #tpu.memory_space<vmem>>, %arg5: memref<1x128xf32, #tpu.memory_space<vmem>>, %arg6: memref<128x128xbf16, #tpu.memory_space<vmem>>, %arg7: memref<1x128xf32, #tpu.memory_space<vmem>>, %arg8: memref<128x128xbf16, #tpu.memory_space<vmem>>, %arg9: memref<1x128xf32, #tpu.memory_space<vmem>>, %arg10: memref<128x128xbf16, #tpu.memory_space<vmem>>, %arg11: memref<1x128xf32, #tpu.memory_space<vmem>>, %arg12: memref<128x1024xbf16, #tpu.memory_space<vmem>>, %arg13: memref<1x1024xf32, #tpu.memory_space<vmem>>, %arg14: memref<8x1024xf32, #tpu.memory_space<vmem>>) attributes {dimension_semantics = [#tpu.dimension_semantics<parallel>], iteration_bounds = array<i64: 1>, scalar_prefetch = 0 : i64, scratch_operands = 0 : i64, tpu.core_type = #tpu.core_type<tc>, window_params = [{transform_indices = @transform_0, window_bounds = array<i64: 8, 1>}, {transform_indices = @transform_1, window_bounds = array<i64: 8, 1024>}, {pipeline_mode = #tpu.pipeline_mode<synchronous>, transform_indices = @transform_2, window_bounds = array<i64: 1024, 128>}, {pipeline_mode = #tpu.pipeline_mode<synchronous>, transform_indices = @transform_3, window_bounds = array<i64: 1, 128>}, {pipeline_mode = #tpu.pipeline_mode<synchronous>, transform_indices = @transform_4, window_bounds = array<i64: 1, 128>}, {pipeline_mode = #tpu.pipeline_mode<synchronous>, transform_indices = @transform_5, window_bounds = array<i64: 128, 128>}, {pipeline_mode = #tpu.pipeline_mode<synchronous>, transform_indices = @transform_6, window_bounds = array<i64: 1, 128>}, {pipeline_mode = #tpu.pipeline_mode<synchronous>, transform_indices = @transform_7, window_bounds = array<i64: 128, 128>}, {pipeline_mode = #tpu.pipeline_mode<synchronous>, transform_indices = @transform_8, window_bounds = array<i64: 1, 128>}, {pipeline_mode = #tpu.pipeline_mode<synchronous>, transform_indices = @transform_9, window_bounds = array<i64: 128, 128>}, {pipeline_mode = #tpu.pipeline_mode<synchronous>, transform_indices = @transform_10, window_bounds = array<i64: 1, 128>}, {pipeline_mode = #tpu.pipeline_mode<synchronous>, transform_indices = @transform_11, window_bounds = array<i64: 128, 1024>}, {pipeline_mode = #tpu.pipeline_mode<synchronous>, transform_indices = @transform_12, window_bounds = array<i64: 1, 1024>}, {transform_indices = @transform_13, window_bounds = array<i64: 8, 1024>}]} {
    %c0 = arith.constant 0 : index
    %c0_0 = arith.constant 0 : index
    %0 = vector.load %arg2[%c0, %c0_0] : memref<8x1024xbf16, #tpu.memory_space<vmem>>, vector<8x1024xbf16>
    %c0_1 = arith.constant 0 : index
    %c0_2 = arith.constant 0 : index
    %1 = vector.load %arg1[%c0_1, %c0_2] : memref<8x1xf32, #tpu.memory_space<vmem>>, vector<8x1xf32>
    %c0_3 = arith.constant 0 : index
    %c0_4 = arith.constant 0 : index
    %2 = vector.load %arg3[%c0_3, %c0_4] : memref<1024x128xbf16, #tpu.memory_space<vmem>>, vector<1024x128xbf16>
    %cst = arith.constant dense<0.000000e+00> : vector<8x128xf32>
    %3 = tpu.matmul %0, %2, %cst {dimension_numbers = #tpu.dot_dimension_numbers<[1], [0], [0], [1], [0, 0, 1, 1], [], []>} : vector<8x1024xbf16>, vector<1024x128xbf16>, vector<8x128xf32> -> vector<8x128xf32>
    %c0_5 = arith.constant 0 : index
    %c0_6 = arith.constant 0 : index
    %4 = vector.load %arg4[%c0_5, %c0_6] : memref<1x128xf32, #tpu.memory_space<vmem>>, vector<1x128xf32>
    %5 = vector.broadcast %1 : vector<8x1xf32> to vector<8x128xf32>
    %6 = vector.broadcast %4 : vector<1x128xf32> to vector<8x128xf32>
    %7 = arith.mulf %5, %6 : vector<8x128xf32>
    %8 = arith.addf %3, %7 : vector<8x128xf32>
    %c0_7 = arith.constant 0 : index
    %c0_8 = arith.constant 0 : index
    %9 = vector.load %arg5[%c0_7, %c0_8] : memref<1x128xf32, #tpu.memory_space<vmem>>, vector<1x128xf32>
    %10 = vector.broadcast %9 : vector<1x128xf32> to vector<8x128xf32>
    %11 = arith.addf %8, %10 : vector<8x128xf32>
    %12 = arith.negf %11 : vector<8x128xf32>
    %13 = math.exp %12 : vector<8x128xf32>
    %cst_9 = arith.constant 1.000000e+00 : f32
    %14 = vector.broadcast %cst_9 : f32 to vector<8x128xf32>
    %15 = arith.addf %14, %13 : vector<8x128xf32>
    %16 = arith.divf %14, %15 : vector<8x128xf32>
    %17 = arith.mulf %11, %16 : vector<8x128xf32>
    %18 = arith.truncf %17 : vector<8x128xf32> to vector<8x128xbf16>
    %c0_10 = arith.constant 0 : index
    %c0_11 = arith.constant 0 : index
    %19 = vector.load %arg6[%c0_10, %c0_11] : memref<128x128xbf16, #tpu.memory_space<vmem>>, vector<128x128xbf16>
    %cst_12 = arith.constant dense<0.000000e+00> : vector<8x128xf32>
    %20 = tpu.matmul %18, %19, %cst_12 {dimension_numbers = #tpu.dot_dimension_numbers<[1], [0], [0], [1], [0, 0, 1, 1], [], []>} : vector<8x128xbf16>, vector<128x128xbf16>, vector<8x128xf32> -> vector<8x128xf32>
    %c0_13 = arith.constant 0 : index
    %c0_14 = arith.constant 0 : index
    %21 = vector.load %arg7[%c0_13, %c0_14] : memref<1x128xf32, #tpu.memory_space<vmem>>, vector<1x128xf32>
    %22 = vector.broadcast %21 : vector<1x128xf32> to vector<8x128xf32>
    %23 = arith.addf %20, %22 : vector<8x128xf32>
    %24 = arith.negf %23 : vector<8x128xf32>
    %25 = math.exp %24 : vector<8x128xf32>
    %cst_15 = arith.constant 1.000000e+00 : f32
    %26 = vector.broadcast %cst_15 : f32 to vector<8x128xf32>
    %27 = arith.addf %26, %25 : vector<8x128xf32>
    %28 = arith.divf %26, %27 : vector<8x128xf32>
    %29 = arith.mulf %23, %28 : vector<8x128xf32>
    %30 = arith.truncf %29 : vector<8x128xf32> to vector<8x128xbf16>
    %c0_16 = arith.constant 0 : index
    %c0_17 = arith.constant 0 : index
    %31 = vector.load %arg8[%c0_16, %c0_17] : memref<128x128xbf16, #tpu.memory_space<vmem>>, vector<128x128xbf16>
    %cst_18 = arith.constant dense<0.000000e+00> : vector<8x128xf32>
    %32 = tpu.matmul %30, %31, %cst_18 {dimension_numbers = #tpu.dot_dimension_numbers<[1], [0], [0], [1], [0, 0, 1, 1], [], []>} : vector<8x128xbf16>, vector<128x128xbf16>, vector<8x128xf32> -> vector<8x128xf32>
    %c0_19 = arith.constant 0 : index
    %c0_20 = arith.constant 0 : index
    %33 = vector.load %arg9[%c0_19, %c0_20] : memref<1x128xf32, #tpu.memory_space<vmem>>, vector<1x128xf32>
    %34 = vector.broadcast %33 : vector<1x128xf32> to vector<8x128xf32>
    %35 = arith.addf %32, %34 : vector<8x128xf32>
    %36 = arith.negf %35 : vector<8x128xf32>
    %37 = math.exp %36 : vector<8x128xf32>
    %cst_21 = arith.constant 1.000000e+00 : f32
    %38 = vector.broadcast %cst_21 : f32 to vector<8x128xf32>
    %39 = arith.addf %38, %37 : vector<8x128xf32>
    %40 = arith.divf %38, %39 : vector<8x128xf32>
    %41 = arith.mulf %35, %40 : vector<8x128xf32>
    %42 = arith.truncf %41 : vector<8x128xf32> to vector<8x128xbf16>
    %c0_22 = arith.constant 0 : index
    %c0_23 = arith.constant 0 : index
    %43 = vector.load %arg10[%c0_22, %c0_23] : memref<128x128xbf16, #tpu.memory_space<vmem>>, vector<128x128xbf16>
    %cst_24 = arith.constant dense<0.000000e+00> : vector<8x128xf32>
    %44 = tpu.matmul %42, %43, %cst_24 {dimension_numbers = #tpu.dot_dimension_numbers<[1], [0], [0], [1], [0, 0, 1, 1], [], []>} : vector<8x128xbf16>, vector<128x128xbf16>, vector<8x128xf32> -> vector<8x128xf32>
    %c0_25 = arith.constant 0 : index
    %c0_26 = arith.constant 0 : index
    %45 = vector.load %arg11[%c0_25, %c0_26] : memref<1x128xf32, #tpu.memory_space<vmem>>, vector<1x128xf32>
    %46 = vector.broadcast %45 : vector<1x128xf32> to vector<8x128xf32>
    %47 = arith.addf %44, %46 : vector<8x128xf32>
    %48 = arith.negf %47 : vector<8x128xf32>
    %49 = math.exp %48 : vector<8x128xf32>
    %cst_27 = arith.constant 1.000000e+00 : f32
    %50 = vector.broadcast %cst_27 : f32 to vector<8x128xf32>
    %51 = arith.addf %50, %49 : vector<8x128xf32>
    %52 = arith.divf %50, %51 : vector<8x128xf32>
    %53 = arith.mulf %47, %52 : vector<8x128xf32>
    %54 = arith.truncf %53 : vector<8x128xf32> to vector<8x128xbf16>
    %c0_28 = arith.constant 0 : index
    %c0_29 = arith.constant 0 : index
    %55 = vector.load %arg12[%c0_28, %c0_29] : memref<128x1024xbf16, #tpu.memory_space<vmem>>, vector<128x1024xbf16>
    %cst_30 = arith.constant dense<0.000000e+00> : vector<8x1024xf32>
    %56 = tpu.matmul %54, %55, %cst_30 {dimension_numbers = #tpu.dot_dimension_numbers<[1], [0], [0], [1], [0, 0, 1, 1], [], []>} : vector<8x128xbf16>, vector<128x1024xbf16>, vector<8x1024xf32> -> vector<8x1024xf32>
    %c0_31 = arith.constant 0 : index
    %c0_32 = arith.constant 0 : index
    %57 = vector.load %arg13[%c0_31, %c0_32] : memref<1x1024xf32, #tpu.memory_space<vmem>>, vector<1x1024xf32>
    %58 = vector.broadcast %57 : vector<1x1024xf32> to vector<8x1024xf32>
    %59 = arith.addf %56, %58 : vector<8x1024xf32>
    %c0_33 = arith.constant 0 : index
    %c0_34 = arith.constant 0 : index
    %60 = vector.load %arg14[%c0_33, %c0_34] : memref<8x1024xf32, #tpu.memory_space<vmem>>, vector<8x1024xf32>
    tpu.vector_store %arg14[%c0_33, %c0_34], %59 {strides = array<i32>} : memref<8x1024xf32, #tpu.memory_space<vmem>>, vector<8x1024xf32>,
    return
  }
  func.func @transform_0(%arg0: i32) -> (i32, i32) {
    %c0_i32 = arith.constant 0 : i32
    %c0_i32_0 = arith.constant 0 : i32
    return %arg0, %c0_i32 : i32, i32
  }
  func.func @transform_1(%arg0: i32) -> (i32, i32) {
    %c0_i32 = arith.constant 0 : i32
    %c0_i32_0 = arith.constant 0 : i32
    return %arg0, %c0_i32 : i32, i32
  }
  func.func @transform_2(%arg0: i32) -> (i32, i32) {
    %c0_i32 = arith.constant 0 : i32
    %c0_i32_0 = arith.constant 0 : i32
    %c0_i32_1 = arith.constant 0 : i32
    return %c0_i32, %c0_i32_0 : i32, i32
  }
  func.func @transform_3(%arg0: i32) -> (i32, i32) {
    %c0_i32 = arith.constant 0 : i32
    %c0_i32_0 = arith.constant 0 : i32
    %c0_i32_1 = arith.constant 0 : i32
    return %c0_i32, %c0_i32_0 : i32, i32
  }
  func.func @transform_4(%arg0: i32) -> (i32, i32) {
    %c0_i32 = arith.constant 0 : i32
    %c0_i32_0 = arith.constant 0 : i32
    %c0_i32_1 = arith.constant 0 : i32
    return %c0_i32, %c0_i32_0 : i32, i32
  }
  func.func @transform_5(%arg0: i32) -> (i32, i32) {
    %c0_i32 = arith.constant 0 : i32
    %c0_i32_0 = arith.constant 0 : i32
    %c0_i32_1 = arith.constant 0 : i32
    return %c0_i32, %c0_i32_0 : i32, i32
  }
  func.func @transform_6(%arg0: i32) -> (i32, i32) {
    %c0_i32 = arith.constant 0 : i32
    %c0_i32_0 = arith.constant 0 : i32
    %c0_i32_1 = arith.constant 0 : i32
    return %c0_i32, %c0_i32_0 : i32, i32
  }
  func.func @transform_7(%arg0: i32) -> (i32, i32) {
    %c0_i32 = arith.constant 0 : i32
    %c0_i32_0 = arith.constant 0 : i32
    %c0_i32_1 = arith.constant 0 : i32
    return %c0_i32, %c0_i32_0 : i32, i32
  }
  func.func @transform_8(%arg0: i32) -> (i32, i32) {
    %c0_i32 = arith.constant 0 : i32
    %c0_i32_0 = arith.constant 0 : i32
    %c0_i32_1 = arith.constant 0 : i32
    return %c0_i32, %c0_i32_0 : i32, i32
  }
  func.func @transform_9(%arg0: i32) -> (i32, i32) {
    %c0_i32 = arith.constant 0 : i32
    %c0_i32_0 = arith.constant 0 : i32
    %c0_i32_1 = arith.constant 0 : i32
    return %c0_i32, %c0_i32_0 : i32, i32
  }
  func.func @transform_10(%arg0: i32) -> (i32, i32) {
    %c0_i32 = arith.constant 0 : i32
    %c0_i32_0 = arith.constant 0 : i32
    %c0_i32_1 = arith.constant 0 : i32
    return %c0_i32, %c0_i32_0 : i32, i32
  }
  func.func @transform_11(%arg0: i32) -> (i32, i32) {
    %c0_i32 = arith.constant 0 : i32
    %c0_i32_0 = arith.constant 0 : i32
    %c0_i32_1 = arith.constant 0 : i32
    return %c0_i32, %c0_i32_0 : i32, i32
  }
  func.func @transform_12(%arg0: i32) -> (i32, i32) {
    %c0_i32 = arith.constant 0 : i32
    %c0_i32_0 = arith.constant 0 : i32
    %c0_i32_1 = arith.constant 0 : i32
    return %c0_i32, %c0_i32_0 : i32, i32
  }
  func.func @transform_13(%arg0: i32) -> (i32, i32) {
    %c0_i32 = arith.constant 0 : i32
    %c0_i32_0 = arith.constant 0 : i32
    return %arg0, %c0_i32 : i32, i32
  }
}

</mosaic_0001>

<bundles_post_ra>
// kernel: tpu_custom_call.1
= control target key start
LH: loop header
LB: loop body
LE: loop exit
PB: predicated region body
PF: predicated region fallthrough
CT: control target
= control target key end

     0   :  { %18 = vsyncpa [#allocation3], 0  ;;  %s2710_s0 = inlined_call_operand.vmem [shape: f32[8,1], index: 0, kind: input, shape index: {}]   ;;  %s2711_s1 = inlined_call_operand.hbm [shape: bf16[8,1024], index: 1, kind: input, shape index: {}]   ;;  %s2712_s2 = inlined_call_operand.hbm [shape: bf16[1024,128], index: 2, kind: input, shape index: {}]   ;;  %s2713_s3 = inlined_call_operand.vmem [shape: f32[1,128], index: 3, kind: input, shape index: {}]   ;;  %s2714_s4 = inlined_call_operand.vmem [shape: f32[1,128], index: 4, kind: input, shape index: {}]   ;;  %s2715_s5 = inlined_call_operand.hbm [shape: bf16[128,128], index: 5, kind: input, shape index: {}]   ;;  %s2716_s6 = inlined_call_operand.vmem [shape: f32[1,128], index: 6, kind: input, shape index: {}]   ;;  %s2717_s7 = inlined_call_operand.hbm [shape: bf16[128,128], index: 7, kind: input, shape index: {}]   ;;  %s2718_s8 = inlined_call_operand.vmem [shape: f32[1,128], index: 8, kind: input, shape index: {}]   ;;  %s2719_s9 = inlined_call_operand.hbm [shape: bf16[128,128], index: 9, kind: input, shape index: {}]   ;;  %s2720_s10 = inlined_call_operand.vmem [shape: f32[1,128], index: 10, kind: input, shape index: {}]   ;;  %s2721_s11 = inlined_call_operand.hbm [shape: bf16[128,1024], index: 11, kind: input, shape index: {}]   ;;  %s2722_s12 = inlined_call_operand.vmem [shape: f32[1,1024], index: 12, kind: input, shape index: {}]   ;;  %s2723_s13 = inlined_call_operand.hbm [shape: f32[8,1024], index: 13, kind: output, shape index: {}]  }
   0x1   :  { %19 = vsyncpa [#allocation6], 0 }
   0x2   :  { %20 = vsyncpa [#allocation9], 0 }
   0x3   :  { %21 = vsyncpa [#allocation12], 0 }
   0x4   :  { %22 = vsyncpa [#allocation4], 0  ;;  %s2468_s25 = smov [#allocation5]   ;;  %s2304_s29 = scalar_lea.hbm %s2712_s2, 8192 }
   0x5   :  { %s40_s26 = sshll.u32 %s2468_s25, 4  ;;  %p2305_p0 = scmp.ne.s32.totalorder %s2712_s2, %s2304_s29  ;;  %s41_s26 = int_to_ptr.vmem [resolvable:$true] %s40_s26 }
   0x6   :  { %p2308_p1 = scmp.lt.u32.totalorder %s2304_s29, %s2712_s2 }
   0x8   :  { %p2310_p2 = pnand %p2308_p1, %p2305_p0 }
   0xa   :  { %2313 = shalt.err (!%p2310_p2)
}
   0xb   :  { %s2314_s17 = scalar_lea.vmem %s41_s26, 8192  ;;  %p2319_p4 = scmp.lt.s32.totalorder %s41_s26, %s41_s26 }
   0xc   :  { %p2315_p3 = scmp.ne.s32.totalorder %s41_s26, %s2314_s17  ;;  %p2320_p5 = scmp.lt.s32.totalorder %s2314_s17, %s2314_s17 }
   0xe   :  { %p2321_p6 = por %p2320_p5, %p2319_p4 }
  0x10   :  { %p2322_p7 = pnand %p2321_p6, %p2315_p3 }
  0x12   :  { %2325 = shalt.err (!%p2322_p7)
}
  0x13   :  { %s2469_s18 = smov 64   ;;  %s2470_s19 = smov 4  }
  0x14   :  { %46 = dma.hbm_to_vmem [thread:$0]  %s2712_s2, 8192, %s41_s26, [#allocation6], %s2469_s18, %s2469_s18, %s2470_s19  }
  0x15   :  { %s2471_s22 = smov [#allocation8]   ;;  %s2472_s24 = smov [#allocation2]  }
  0x16   :  { %s70_s23 = sshll.u32 %s2471_s22, 4  ;;  %s31_s25 = sshll.u32 %s2472_s24, 4  ;;  %s71_s23 = int_to_ptr.vmem [resolvable:$true] %s70_s23  ;;  %s32_s25 = int_to_ptr.vmem [resolvable:$true] %s31_s25 }
  0x17   :  { %s2326_s29 = scalar_lea.hbm %s2717_s7, 1024 }
  0x18   :  { %p2327_p8 = scmp.ne.s32.totalorder %s2717_s7, %s2326_s29  ;;  %p2330_p9 = scmp.lt.u32.totalorder %s2326_s29, %s2717_s7 }
  0x1a   :  { %p2332_p10 = pnand %p2330_p9, %p2327_p8 }
  0x1c   :  { %2335 = shalt.err (!%p2332_p10)
}
  0x1d   :  { %s2336_s2 = scalar_lea.vmem %s71_s23, 1024  ;;  %p2341_p12 = scmp.lt.s32.totalorder %s71_s23, %s71_s23 }
  0x1e   :  { %p2337_p11 = scmp.ne.s32.totalorder %s71_s23, %s2336_s2  ;;  %p2342_p13 = scmp.lt.s32.totalorder %s2336_s2, %s2336_s2 }
  0x20   :  { %p2343_p0 = por %p2342_p13, %p2341_p12 }
  0x22   :  { %p2344_p1 = pnand %p2343_p0, %p2337_p11 }
  0x24   :  { %2347 = shalt.err (!%p2344_p1)
}
  0x25   :  { %76 = dma.hbm_to_vmem [thread:$0]  %s2717_s7, 1024, %s71_s23, [#allocation9], %s2469_s18, %s2469_s18, %s2470_s19  }
  0x26   :  { %s2348_s22 = scalar_lea.hbm %s2711_s1, 512 }
  0x27   :  { %p2349_p2 = scmp.ne.s32.totalorder %s2711_s1, %s2348_s22  ;;  %p2352_p3 = scmp.lt.u32.totalorder %s2348_s22, %s2711_s1 }
  0x29   :  { %p2354_p4 = pnand %p2352_p3, %p2349_p2 }
  0x2b   :  { %2357 = shalt.err (!%p2354_p4)
}
  0x2c   :  { %s2358_s30 = scalar_lea.vmem %s32_s25, 512  ;;  %p2363_p6 = scmp.lt.s32.totalorder %s32_s25, %s32_s25 }
  0x2d   :  { %p2359_p5 = scmp.ne.s32.totalorder %s32_s25, %s2358_s30  ;;  %p2364_p7 = scmp.lt.s32.totalorder %s2358_s30, %s2358_s30 }
  0x2f   :  { %p2365_p8 = por %p2364_p7, %p2363_p6 }
  0x31   :  { %p2366_p9 = pnand %p2365_p8, %p2359_p5 }
  0x33   :  { %2369 = shalt.err (!%p2366_p9)
}
  0x34   :  { %34 = dma.hbm_to_vmem [thread:$0]  %s2711_s1, 512, %s32_s25, [#allocation3]  }
  0x35   :  { %s2473_s14 = smov [#allocation7]   ;;  %s2474_s16 = smov [#allocation10]  }
  0x36   :  { %s56_s15 = sshll.u32 %s2473_s14, 4  ;;  %s84_s2 = sshll.u32 %s2474_s16, 4  ;;  %s57_s15 = int_to_ptr.vmem [resolvable:$true] %s56_s15  ;;  %s85_s2 = int_to_ptr.vmem [resolvable:$true] %s84_s2 }
  0x37   :  { %s2370_s20 = scalar_lea.hbm %s2715_s5, 1024 }
  0x38   :  { %p2371_p10 = scmp.ne.s32.totalorder %s2715_s5, %s2370_s20  ;;  %p2374_p11 = scmp.lt.u32.totalorder %s2370_s20, %s2715_s5 }
  0x3a   :  { %p2376_p12 = pnand %p2374_p11, %p2371_p10 }
  0x3c   :  { %2379 = shalt.err (!%p2376_p12)
}
  0x3d   :  { %s2380_s1 = scalar_lea.vmem %s57_s15, 1024  ;;  %p2385_p0 = scmp.lt.s32.totalorder %s57_s15, %s57_s15 }
  0x3e   :  { %p2381_p13 = scmp.ne.s32.totalorder %s57_s15, %s2380_s1  ;;  %p2386_p1 = scmp.lt.s32.totalorder %s2380_s1, %s2380_s1 }
  0x40   :  { %p2387_p2 = por %p2386_p1, %p2385_p0 }
  0x42   :  { %p2388_p3 = pnand %p2387_p2, %p2381_p13 }
  0x44   :  { %2391 = shalt.err (!%p2388_p3)
}
  0x45   :  { %62 = dma.hbm_to_vmem [thread:$0]  %s2715_s5, 1024, %s57_s15, [#allocation6], %s2469_s18, %s2469_s18, %s2470_s19  }
  0x46   :  { %s2392_s7 = scalar_lea.hbm %s2719_s9, 1024 }
  0x47   :  { %p2393_p4 = scmp.ne.s32.totalorder %s2719_s9, %s2392_s7  ;;  %p2396_p5 = scmp.lt.u32.totalorder %s2392_s7, %s2719_s9 }
  0x49   :  { %p2398_p6 = pnand %p2396_p5, %p2393_p4 }
  0x4b   :  { %2401 = shalt.err (!%p2398_p6)
}
  0x4c   :  { %s2402_s17 = scalar_lea.vmem %s85_s2, 1024  ;;  %p2407_p8 = scmp.lt.s32.totalorder %s85_s2, %s85_s2 }
  0x4d   :  { %p2403_p7 = scmp.ne.s32.totalorder %s85_s2, %s2402_s17  ;;  %p2408_p9 = scmp.lt.s32.totalorder %s2402_s17, %s2402_s17 }
  0x4f   :  { %p2409_p10 = por %p2408_p9, %p2407_p8 }
  0x51   :  { %p2410_p11 = pnand %p2409_p10, %p2403_p7 }
  0x53   :  { %2413 = shalt.err (!%p2410_p11)
}
  0x54   :  { %90 = dma.hbm_to_vmem [thread:$0]  %s2719_s9, 1024, %s85_s2, [#allocation9], %s2469_s18, %s2469_s18, %s2470_s19  }
  0x55   :  { %s2475_s20 = smov [#allocation11]   ;;  %s2414_s27 = scalar_lea.hbm %s2721_s11, 8192 }
  0x56   :  { %s98_s21 = sshll.u32 %s2475_s20, 4  ;;  %p2415_p12 = scmp.ne.s32.totalorder %s2721_s11, %s2414_s27  ;;  %s99_s21 = int_to_ptr.vmem [resolvable:$true] %s98_s21 }
  0x57   :  { %p2418_p13 = scmp.lt.u32.totalorder %s2414_s27, %s2721_s11 }
  0x59   :  { %p2420_p0 = pnand %p2418_p13, %p2415_p12 }
  0x5b   :  { %2423 = shalt.err (!%p2420_p0)
}
  0x5c   :  { %s2424_s30 = scalar_lea.vmem %s99_s21, 8192  ;;  %p2429_p2 = scmp.lt.s32.totalorder %s99_s21, %s99_s21 }
  0x5d   :  { %p2425_p1 = scmp.ne.s32.totalorder %s99_s21, %s2424_s30  ;;  %p2430_p3 = scmp.lt.s32.totalorder %s2424_s30, %s2424_s30 }
  0x5f   :  { %p2431_p4 = por %p2430_p3, %p2429_p2 }
  0x61   :  { %p2432_p5 = pnand %p2431_p4, %p2425_p1 }
  0x63   :  { %2435 = shalt.err (!%p2432_p5)
}
  0x64   :  { %s2476_s9 = smov 512   ;;  %s2477_s18 = smov 32  }
  0x65   :  { %104 = dma.hbm_to_vmem [thread:$0]  %s2721_s11, 8192, %s99_s21, [#allocation12], %s2476_s9, %s2476_s9, %s2477_s18  }
  0x66   :  { %2458 = dma.done.wait [#allocation3], 512  }
  0x67   :  { %2459 = vsyncadd [#allocation3], 4294966784 }
  0x68   :  { %2460 = dma.done.wait [#allocation6], 9216  }
  0x69   :  { %2461 = vsyncadd [#allocation6], 4294958080 }
  0x6a   :  { %2462 = dma.done.wait [#allocation9], 2048  }
  0x6b   :  { %2463 = vsyncadd [#allocation9], 4294965248 }
  0x6c   :  { %2464 = dma.done.wait [#allocation12], 8192  }
  0x6d   :  { %2465 = vsyncadd [#allocation12], 4294959104  ;;  %v2478_v0 = vmov 0   ;;  %v2192_v1 = vld [vmem:[#allocation5 + $0x40] sm:$0xff]   ;;  %v2196_v5 = vld [vmem:[#allocation5 + $0x48] sm:$0xff]   ;;  %vm2480_vm0 = vmmov 0  }
  0x6e   :  { %2191 = vset.pattern.permute.xlu0 %v2478_v0  ;;  %v2193_v2 = vld [vmem:[#allocation5 + $0xc0] sm:$0xff]   ;;  %2002 = vmatprep.subr.bf16.mxu0 %v2192_v1  ;;  %v2197_v6 = vld [vmem:[#allocation5 + $0xc8] sm:$0xff]   ;;  %v2200_v9 = vld [vmem:[#allocation5 + $0x50] sm:$0xff]  }
  0x6f   :  { %v2194_v3 = vld [vmem:[#allocation5] sm:$0xff]   ;;  %2024 = vmatprep.subr.bf16.mxu1 %v2193_v2  ;;  %v2198_v7 = vld [vmem:[#allocation5 + $0x8] sm:$0xff]   ;;  %v2201_v10 = vld [vmem:[#allocation5 + $0xd0] sm:$0xff]  }
  0x70   :  { %v2195_v4 = vld [vmem:[#allocation5 + $0x80] sm:$0xff]   ;;  %2003 = vmatpush3.bf16.msra.mxu0 %v2194_v3  ;;  %v2199_v8 = vld [vmem:[#allocation5 + $0x88] sm:$0xff]   ;;  %v2202_v11 = vld [vmem:[#allocation5 + $0x10] sm:$0xff]  }
  0x71   :  { %2025 = vmatpush3.bf16.msra.mxu1 %v2195_v4  ;;  %2004 = vmatprep.subr.bf16.mxu0 %v2196_v5  ;;  %v2203_v12 = vld [vmem:[#allocation5 + $0x90] sm:$0xff]   ;;  %v2204_v13 = vld [vmem:[#allocation5 + $0x58] sm:$0xff]   ;;  %v2208_v17 = vld [vmem:[#allocation5 + $0x60] sm:$0xff]  }
  0x72   :  { %2026 = vmatprep.subr.bf16.mxu1 %v2197_v6  ;;  %v2205_v14 = vld [vmem:[#allocation5 + $0xd8] sm:$0xff]   ;;  %v2209_v18 = vld [vmem:[#allocation5 + $0xe0] sm:$0xff]   ;;  %v2212_v21 = vld [vmem:[#allocation5 + $0x68] sm:$0xff]  }
  0x73   :  { %v2206_v15 = vld [vmem:[#allocation5 + $0x18] sm:$0xff]   ;;  %v2210_v19 = vld [vmem:[#allocation5 + $0x20] sm:$0xff]   ;;  %v2213_v22 = vld [vmem:[#allocation5 + $0xe8] sm:$0xff]  }
  0x74   :  { %2005 = vmatpush3.bf16.msra.mxu0 %v2198_v7  ;;  %v2207_v16 = vld [vmem:[#allocation5 + $0x98] sm:$0xff]   ;;  %v2211_v20 = vld [vmem:[#allocation5 + $0xa0] sm:$0xff]   ;;  %v2214_v23 = vld [vmem:[#allocation5 + $0x28] sm:$0xff]  }
  0x75   :  { %2027 = vmatpush3.bf16.msra.mxu1 %v2199_v8  ;;  %2006 = vmatprep.subr.bf16.mxu0 %v2200_v9  ;;  %v2215_v24 = vld [vmem:[#allocation5 + $0xa8] sm:$0xff]   ;;  %v2216_v25 = vld [vmem:[#allocation5 + $0x70] sm:$0xff]   ;;  %v2220_v29 = vld [vmem:[#allocation5 + $0x78] sm:$0xff]  }
  0x76   :  { %2028 = vmatprep.subr.bf16.mxu1 %v2201_v10  ;;  %v2217_v26 = vld [vmem:[#allocation5 + $0xf0] sm:$0xff]   ;;  %v2221_v30 = vld [vmem:[#allocation5 + $0xf8] sm:$0xff]   ;;  %v126_v33 = vld [vmem:[#allocation2] sm:$0xff] }
  0x77   :  { %v2218_v27 = vld [vmem:[#allocation5 + $0x30] sm:$0xff]   ;;  %v2222_v31 = vld [vmem:[#allocation5 + $0x38] sm:$0xff]   ;;  %v127_v34 = vld [vmem:[#allocation2 + $0x8] sm:$0xff]  ;;  %v1834_v35 = vcombine.low %v126_v33, %v126_v33  ;;  %v1835_v36 = vcombine.high %v126_v33, %v126_v33 }
  0x78   :  { %2007 = vmatpush3.bf16.msra.mxu0 %v2202_v11  ;;  %v2219_v28 = vld [vmem:[#allocation5 + $0xb0] sm:$0xff]   ;;  %v2223_v32 = vld [vmem:[#allocation5 + $0xb8] sm:$0xff]   ;;  %v1836_v37 = vcombine.low %v127_v34, %v127_v34  ;;  %v1837_v38 = vcombine.high %v127_v34, %v127_v34  ;;  %v2228_v39 = vld [vmem:[#allocation5 + $0x140] sm:$0xff]  }
  0x79   :  { %2029 = vmatpush3.bf16.msra.mxu1 %v2203_v12  ;;  %2008 = vmatprep.subr.bf16.mxu0 %v2204_v13  ;;  %v2229_v40 = vld [vmem:[#allocation5 + $0x1c0] sm:$0xff]   ;;  %v2232_v43 = vld [vmem:[#allocation5 + $0x148] sm:$0xff]   ;;  %v2236_v47 = vld [vmem:[#allocation5 + $0x150] sm:$0xff]  }
  0x7a   :  { %2030 = vmatprep.subr.bf16.mxu1 %v2205_v14  ;;  %716 = vmatprep.mubr.bf16.mxu0 %v1835_v36  ;;  %v2230_v41 = vld [vmem:[#allocation5 + $0x100] sm:$0xff]   ;;  %v2233_v44 = vld [vmem:[#allocation5 + $0x1c8] sm:$0xff]   ;;  %v2237_v48 = vld [vmem:[#allocation5 + $0x1d0] sm:$0xff]  }
  0x7b   :  { %756 = vmatprep.mubr.bf16.mxu1 %v1837_v38  ;;  %v2231_v42 = vld [vmem:[#allocation5 + $0x180] sm:$0xff]   ;;  %v2234_v45 = vld [vmem:[#allocation5 + $0x108] sm:$0xff]   ;;  %v2238_v49 = vld [vmem:[#allocation5 + $0x110] sm:$0xff]  }
  0x7c   :  { %2009 = vmatpush3.bf16.msra.mxu0 %v2206_v15  ;;  %v2235_v46 = vld [vmem:[#allocation5 + $0x188] sm:$0xff]   ;;  %v2239_v50 = vld [vmem:[#allocation5 + $0x190] sm:$0xff]   ;;  %v2240_v51 = vld [vmem:[#allocation5 + $0x158] sm:$0xff]  }
  0x7d   :  { %2031 = vmatpush3.bf16.msra.mxu1 %v2207_v16  ;;  %2010 = vmatprep.subr.bf16.mxu0 %v2208_v17  ;;  %v2241_v52 = vld [vmem:[#allocation5 + $0x1d8] sm:$0xff]   ;;  %v2244_v55 = vld [vmem:[#allocation5 + $0x160] sm:$0xff]   ;;  %v2248_v59 = vld [vmem:[#allocation5 + $0x168] sm:$0xff]   ;;  %v2479_v16 = vmov 0.0  }
  0x7e   :  { %2032 = vmatprep.subr.bf16.mxu1 %v2209_v18  ;;  %v2242_v53 = vld [vmem:[#allocation5 + $0x118] sm:$0xff]   ;;  %v2245_v56 = vld [vmem:[#allocation5 + $0x1e0] sm:$0xff]   ;;  %v2249_v60 = vld [vmem:[#allocation5 + $0x1e8] sm:$0xff]  }
  0x7f   :  { %v2243_v54 = vld [vmem:[#allocation5 + $0x198] sm:$0xff]   ;;  %v2246_v57 = vld [vmem:[#allocation5 + $0x120] sm:$0xff]   ;;  %v2250_v61 = vld [vmem:[#allocation5 + $0x128] sm:$0xff]  }
  0x80   :  { %2011 = vmatpush3.bf16.msra.mxu0 %v2210_v19  ;;  %v2247_v58 = vld [vmem:[#allocation5 + $0x1a0] sm:$0xff]   ;;  %v2251_v62 = vld [vmem:[#allocation5 + $0x1a8] sm:$0xff]   ;;  %v2252_v63 = vld [vmem:[#allocation5 + $0x170] sm:$0xff]  }
  0x81   :  { %2033 = vmatpush3.bf16.msra.mxu1 %v2211_v20  ;;  %2012 = vmatprep.subr.bf16.mxu0 %v2212_v21  ;;  %v2253_v1 = vld [vmem:[#allocation5 + $0x1f0] sm:$0xff]   ;;  %v2256_v4 = vld [vmem:[#allocation5 + $0x178] sm:$0xff]   ;;  %v2264_v15 = vld [vmem:[#allocation7] sm:$0xff]  }
  0x82   :  { %2034 = vmatprep.subr.bf16.mxu1 %v2213_v22  ;;  %v2254_v2 = vld [vmem:[#allocation5 + $0x130] sm:$0xff]   ;;  %v2257_v5 = vld [vmem:[#allocation5 + $0x1f8] sm:$0xff]   ;;  %v2265_v17 = vld [vmem:[#allocation7 + $0x8] sm:$0xff]  }
  0x83   :  { %v2255_v3 = vld [vmem:[#allocation5 + $0x1b0] sm:$0xff]   ;;  %v2258_v6 = vld [vmem:[#allocation5 + $0x138] sm:$0xff]   ;;  %v2268_v20 = vld [vmem:[#allocation7 + $0x20] sm:$0xff]  }
  0x84   :  { %2013 = vmatpush3.bf16.msra.mxu0 %v2214_v23  ;;  %v2259_v7 = vld [vmem:[#allocation5 + $0x1b8] sm:$0xff]   ;;  %v128_v8 = vld [vmem:[#allocation2 + $0x10] sm:$0xff]  ;;  %v2269_v21 = vld [vmem:[#allocation7 + $0x28] sm:$0xff]  }
  0x85   :  { %2035 = vmatpush3.bf16.msra.mxu1 %v2215_v24  ;;  %2014 = vmatprep.subr.bf16.mxu0 %v2216_v25  ;;  %v1838_v9 = vcombine.low %v128_v8, %v128_v8  ;;  %v1839_v10 = vcombine.high %v128_v8, %v128_v8  ;;  %v129_v11 = vld [vmem:[#allocation2 + $0x18] sm:$0xff]  ;;  %v2266_v18 = vld [vmem:[#allocation7 + $0x10] sm:$0xff]  }
  0x86   :  { %2036 = vmatprep.subr.bf16.mxu1 %v2217_v26  ;;  %v130_v12 = vld [vmem:[%s2710_s0] sm:$0xff]  ;;  %v1840_v13 = vcombine.low %v129_v11, %v129_v11  ;;  %v1841_v14 = vcombine.high %v129_v11, %v129_v11  ;;  %v2270_v22 = vld [vmem:[#allocation7 + $0x30] sm:$0xff]  }
  0x87   :  { %262 = vperm.xlu0 %2191, %v130_v12   ;;  %v2267_v19 = vld [vmem:[#allocation7 + $0x18] sm:$0xff]  }
  0x88   :  { %2015 = vmatpush3.bf16.msra.mxu0 %v2218_v27  ;;  %v2271_v23 = vld [vmem:[#allocation7 + $0x38] sm:$0xff]  }
  0x89   :  { %2037 = vmatpush3.bf16.msra.mxu1 %v2219_v28  ;;  %2016 = vmatprep.subr.bf16.mxu0 %v2220_v29  ;;  %v1833_v24 = vld [vmem:[%s2713_s3] ss:$0 sm:$0xff] }
  0x8a   :  { %2038 = vmatprep.subr.bf16.mxu1 %v2221_v30 }
  0x8c   :  { %2017 = vmatpush3.bf16.msra.mxu0 %v2222_v31 }
  0x8d   :  { %2039 = vmatpush3.bf16.msra.mxu1 %v2223_v32  ;;  %2046 = vmatprep.subr.bf16.mxu0 %v2228_v39 }
  0x8e   :  { %2068 = vmatprep.subr.bf16.mxu1 %v2229_v40 }
  0x8f   :  { %717 = vmatmul.mubr.bf16.vlgmr.msra.gmra.mrb[0].mxu0 %v1834_v35 }
  0x90   :  { %757 = vmatmul.mubr.bf16.vlgmr.msra.gmra.mrb[0].mxu1 %v1836_v37  ;;  %2047 = vmatpush3.bf16.msra.mxu0 %v2230_v41 }
  0x91   :  { %2069 = vmatpush3.bf16.msra.mxu1 %v2231_v42  ;;  %2048 = vmatprep.subr.bf16.mxu0 %v2232_v43 }
  0x92   :  { %2070 = vmatprep.subr.bf16.mxu1 %v2233_v44  ;;  %796 = vmatprep.mubr.bf16.mxu0 %v1839_v10 }
  0x93   :  { %836 = vmatprep.mubr.bf16.mxu1 %v1841_v14 }
  0x94   :  { %2049 = vmatpush3.bf16.msra.mxu0 %v2234_v45 }
  0x95   :  { %2071 = vmatpush3.bf16.msra.mxu1 %v2235_v46  ;;  %2050 = vmatprep.subr.bf16.mxu0 %v2236_v47 }
  0x96   :  { %2072 = vmatprep.subr.bf16.mxu1 %v2237_v48 }
  0x98   :  { %2051 = vmatpush3.bf16.msra.mxu0 %v2238_v49 }
  0x99   :  { %2073 = vmatpush3.bf16.msra.mxu1 %v2239_v50  ;;  %2052 = vmatprep.subr.bf16.mxu0 %v2240_v51  ;;  %v1906_v50 = vld [vmem:[%s2714_s4] ss:$0 sm:$0xff] }
  0x9a   :  { %2074 = vmatprep.subr.bf16.mxu1 %v2241_v52 }
  0x9c   :  { %2053 = vmatpush3.bf16.msra.mxu0 %v2242_v53 }
  0x9d   :  { %2075 = vmatpush3.bf16.msra.mxu1 %v2243_v54  ;;  %2054 = vmatprep.subr.bf16.mxu0 %v2244_v55 }
  0x9e   :  { %2076 = vmatprep.subr.bf16.mxu1 %v2245_v56 }
  0xa0   :  { %2055 = vmatpush3.bf16.msra.mxu0 %v2246_v57 }
  0xa1   :  { %2077 = vmatpush3.bf16.msra.mxu1 %v2247_v58  ;;  %2056 = vmatprep.subr.bf16.mxu0 %v2248_v59  ;;  %v2272_v59 = vld [vmem:[#allocation8] sm:$0xff]  }
  0xa2   :  { %2078 = vmatprep.subr.bf16.mxu1 %v2249_v60  ;;  %v2273_v60 = vld [vmem:[#allocation8 + $0x8] sm:$0xff]  }
  0xa4   :  { %2057 = vmatpush3.bf16.msra.mxu0 %v2250_v61  ;;  %v2274_v61 = vld [vmem:[#allocation8 + $0x10] sm:$0xff]  }
  0xa5   :  { %2079 = vmatpush3.bf16.msra.mxu1 %v2251_v62  ;;  %2058 = vmatprep.subr.bf16.mxu0 %v2252_v63  ;;  %v2275_v62 = vld [vmem:[#allocation8 + $0x18] sm:$0xff]   ;;  %v2276_v63 = vld [vmem:[#allocation8 + $0x20] sm:$0xff]  }
  0xa6   :  { %2080 = vmatprep.subr.bf16.mxu1 %v2253_v1  ;;  %v2277_v1 = vld [vmem:[#allocation8 + $0x28] sm:$0xff]  }
  0xa8   :  { %2059 = vmatpush3.bf16.msra.mxu0 %v2254_v2  ;;  %v2278_v2 = vld [vmem:[#allocation8 + $0x30] sm:$0xff]  }
  0xa9   :  { %2081 = vmatpush3.bf16.msra.mxu1 %v2255_v3  ;;  %2060 = vmatprep.subr.bf16.mxu0 %v2256_v4  ;;  %v2279_v3 = vld [vmem:[#allocation8 + $0x38] sm:$0xff]  }
  0xaa   :  { %2082 = vmatprep.subr.bf16.mxu1 %v2257_v5  ;;  %v1908_v4 = vld [vmem:[%s2716_s6] ss:$0 sm:$0xff] }
  0xac   :  { %2061 = vmatpush3.bf16.msra.mxu0 %v2258_v6 }
  0xad   :  { %2083 = vmatpush3.bf16.msra.mxu1 %v2259_v7  ;;  %2117 = vmatprep.subr.bf16.mxu0 %v2479_v16 }
  0xae   :  { %2137 = vmatprep.subr.bf16.mxu1 %v2479_v16 }
  0xaf   :  { %797 = vmatmul.mubr.bf16.vlgmr.msra.gmra.mrb[4].mxu0 %v1838_v9 }
  0xb0   :  { %837 = vmatmul.mubr.bf16.vlgmr.msra.gmra.mrb[4].mxu1 %v1840_v13  ;;  %2118 = vmatpush3.bf16.msra.mxu0 %v2264_v15 }
  0xb1   :  { %2119 = vmatprep.subr.bf16.mxu0 %v2479_v16  ;;  %2133 = vmatprep.mubr.msk.bf16.mxu0 %vm2480_vm0, %v2479_v16 }
  0xb2   :  { %2153 = vmatprep.mubr.msk.bf16.mxu1 %vm2480_vm0, %v2479_v16  ;;  %2138 = vmatpush3.bf16.msra.mxu1 %v2272_v59 }
  0xb3   :  { %2139 = vmatprep.subr.bf16.mxu1 %v2479_v16 }
  0xb4   :  { %2120 = vmatpush3.bf16.msra.mxu0 %v2265_v17  ;;  %v2280_v17 = vld [vmem:[#allocation10] sm:$0xff]  }
  0xb5   :  { %2121 = vmatprep.subr.bf16.mxu0 %v2479_v16 }
  0xb6   :  { %2140 = vmatpush3.bf16.msra.mxu1 %v2273_v60  ;;  %v1241_v60 = vld [vmem:[#allocation11 + $0xc0] sm:$0xff] }
  0xb7   :  { %2141 = vmatprep.subr.bf16.mxu1 %v2479_v16 }
  0xb8   :  { %2122 = vmatpush3.bf16.msra.mxu0 %v2266_v18  ;;  %v2281_v18 = vld [vmem:[#allocation10 + $0x8] sm:$0xff]  }
  0xb9   :  { %2123 = vmatprep.subr.bf16.mxu0 %v2479_v16 }
  0xba   :  { %2142 = vmatpush3.bf16.msra.mxu1 %v2274_v61  ;;  %v1245_v61 = vld [vmem:[#allocation11 + $0xe0] sm:$0xff] }
  0xbb   :  { %2143 = vmatprep.subr.bf16.mxu1 %v2479_v16 }
  0xbc   :  { %2124 = vmatpush3.bf16.msra.mxu0 %v2267_v19  ;;  %v2282_v19 = vld [vmem:[#allocation10 + $0x10] sm:$0xff]  }
  0xbd   :  { %2125 = vmatprep.subr.bf16.mxu0 %v2479_v16 }
  0xbe   :  { %2144 = vmatpush3.bf16.msra.mxu1 %v2275_v62  ;;  %v1242_v62 = vld [vmem:[#allocation11 + $0xc8] sm:$0xff] }
  0xbf   :  { %2145 = vmatprep.subr.bf16.mxu1 %v2479_v16 }
  0xc0   :  { %2126 = vmatpush3.bf16.msra.mxu0 %v2268_v20  ;;  %v2283_v20 = vld [vmem:[#allocation10 + $0x18] sm:$0xff]  }
  0xc1   :  { %2127 = vmatprep.subr.bf16.mxu0 %v2479_v16 }
  0xc2   :  { %2146 = vmatpush3.bf16.msra.mxu1 %v2276_v63  ;;  %v1963_v63 = vcombine.high %v1241_v60, %v1245_v61 }
  0xc3   :  { %2147 = vmatprep.subr.bf16.mxu1 %v2479_v16 }
  0xc4   :  { %2128 = vmatpush3.bf16.msra.mxu0 %v2269_v21  ;;  %v2284_v21 = vld [vmem:[#allocation10 + $0x20] sm:$0xff]  }
  0xc5   :  { %2129 = vmatprep.subr.bf16.mxu0 %v2479_v16 }
  0xc6   :  { %2148 = vmatpush3.bf16.msra.mxu1 %v2277_v1  ;;  %v1246_v1 = vld [vmem:[#allocation11 + $0xe8] sm:$0xff] }
  0xc7   :  { %2149 = vmatprep.subr.bf16.mxu1 %v2479_v16 }
  0xc8   :  { %2130 = vmatpush3.bf16.msra.mxu0 %v2270_v22  ;;  %v2285_v22 = vld [vmem:[#allocation10 + $0x28] sm:$0xff]  }
  0xc9   :  { %2131 = vmatprep.subr.bf16.mxu0 %v2479_v16 }
  0xca   :  { %2150 = vmatpush3.bf16.msra.mxu1 %v2278_v2  ;;  %v1962_v2 = vcombine.low %v1241_v60, %v1245_v61 }
  0xcb   :  { %2151 = vmatprep.subr.bf16.mxu1 %v2479_v16 }
  0xcc   :  { %2132 = vmatpush3.bf16.msra.mxu0 %v2271_v23  ;;  %v2286_v23 = vld [vmem:[#allocation10 + $0x30] sm:$0xff]  }
  0xcd   :  { %2157 = vmatprep.subr.bf16.mxu0 %v2479_v16 }
  0xce   :  { %2152 = vmatpush3.bf16.msra.mxu1 %v2279_v3  ;;  %v1964_v3 = vcombine.low %v1242_v62, %v1246_v1 }
 0x106   :  { %v263_v25 = vpop.permute.xlu0 %262 }
 0x107   :  { %v271_v28 = vmul.f32 %v1833_v24, %v263_v25  ;;  %v2287_v24 = vld [vmem:[#allocation10 + $0x38] sm:$0xff]  }
 0x108   :  { %v1918_v25 = vld [vmem:[%s2718_s8] ss:$0 sm:$0xff] }
 0x162   :  { %v2018_v26 = vpop.f32.mrb[0].mxu0 }
 0x163   :  { %v2040_v27 = vpop.f32.mrb[0].mxu1  ;;  %v2019_v29 = vpop.f32.mrb[1].mxu0 }
 0x164   :  { %v2041_v30 = vpop.f32.mrb[1].mxu1  ;;  %v2020_v31 = vadd.f32 %v2019_v29, %v2018_v26  ;;  %v2021_v33 = vpop.f32.mrb[2].mxu0 }
 0x165   :  { %v2042_v32 = vadd.f32 %v2041_v30, %v2040_v27  ;;  %v2043_v34 = vpop.f32.mrb[2].mxu1  ;;  %v2022_v35 = vpop.f32.mrb[3].mxu0 }
 0x166   :  { %v2044_v36 = vpop.f32.mrb[3].mxu1  ;;  %v719_v37 = vadd.f32 %v2020_v31, %v271_v28 }
 0x168   :  { %v759_v38 = vadd.f32 %v2042_v32, %v719_v37  ;;  %v1221_v37 = vld [vmem:[#allocation11 + $0x20] sm:$0xff] }
 0x182   :  { %v2062_v39 = vpop.f32.mrb[4].mxu0 }
 0x183   :  { %v2084_v40 = vpop.f32.mrb[4].mxu1  ;;  %v2063_v41 = vpop.f32.mrb[5].mxu0 }
 0x184   :  { %v2085_v42 = vpop.f32.mrb[5].mxu1  ;;  %v2064_v43 = vadd.f32 %v2063_v41, %v2062_v39  ;;  %v2065_v45 = vpop.f32.mrb[6].mxu0 }
 0x185   :  { %v2086_v44 = vadd.f32 %v2085_v42, %v2084_v40  ;;  %v2087_v46 = vpop.f32.mrb[6].mxu1  ;;  %v2066_v47 = vpop.f32.mrb[7].mxu0  ;;  %v1222_v40 = vld [vmem:[#allocation11 + $0x28] sm:$0xff]  ;;  %v1229_v45 = vld [vmem:[#allocation11 + $0x60] sm:$0xff] }
 0x186   :  { %v2088_v48 = vpop.f32.mrb[7].mxu1  ;;  %v799_v49 = vadd.f32 %v2064_v43, %v759_v38  ;;  %v1218_v38 = vld [vmem:[#allocation11 + $0x8] sm:$0xff] }
 0x187   :  { %v1940_v42 = vcombine.low %v1218_v38, %v1222_v40  ;;  %v1941_v43 = vcombine.high %v1218_v38, %v1222_v40  ;;  %v1226_v46 = vld [vmem:[#allocation11 + $0x48] sm:$0xff]  ;;  %v1223_v38 = vld [vmem:[#allocation11 + $0x30] sm:$0xff] }
 0x188   :  { %v839_v51 = vadd.f32 %v2086_v44, %v799_v49  ;;  %v1225_v44 = vld [vmem:[#allocation11 + $0x40] sm:$0xff]  ;;  %v1230_v48 = vld [vmem:[#allocation11 + $0x68] sm:$0xff] }
 0x189   :  { %v1947_v47 = vcombine.high %v1225_v44, %v1229_v45  ;;  %v1946_v49 = vcombine.low %v1225_v44, %v1229_v45  ;;  %v1928_v45 = vld [vmem:[%s2720_s10] ss:$0 sm:$0xff] }
 0x18a   :  { %v851_v52 = vadd.f32 %v1906_v50, %v839_v51  ;;  %v1948_v50 = vcombine.low %v1226_v46, %v1230_v48  ;;  %v1949_v51 = vcombine.high %v1226_v46, %v1230_v48 }
 0x18c   :  { %v1907_v53 = vmul.f32 -1.442695, %v851_v52 }
 0x18e   :  { %2288 = vpow2.f32 %v1907_v53  ;;  %v1237_v53 = vld [vmem:[#allocation11 + $0xa0] sm:$0xff] }
 0x198   :  { %v2289_v54 = vpop.eup %2288 }
 0x199   :  { %v855_v55 = vadd.f32 1.0, %v2289_v54  ;;  %v1234_v54 = vld [vmem:[#allocation11 + $0x88] sm:$0xff] }
 0x19b   :  { %2290 = vrcp.f32 %v855_v55 }
 0x1a5   :  { %v2291_v56 = vpop.eup %2290 }
 0x1a6   :  { %v858_v57 = vmul.f32 %v2291_v56, %v851_v52  ;;  %v1233_v52 = vld [vmem:[#allocation11 + $0x80] sm:$0xff]  ;;  %v1238_v56 = vld [vmem:[#allocation11 + $0xa8] sm:$0xff] }
 0x1a7   :  { %v1955_v55 = vcombine.high %v1233_v52, %v1237_v53  ;;  %v1957_v59 = vcombine.high %v1234_v54, %v1238_v56 }
 0x1a8   :  { %v859_v58 = vpack.c.bf16 %v858_v57, %v858_v57  ;;  %v1954_v57 = vcombine.low %v1233_v52, %v1237_v53 }
 0x1aa   :  { %2134 = vmatmul.mubr.bf16.vlgmr.msra.gmra.mrb[8].mxu0 %v859_v58  ;;  %v1956_v58 = vcombine.low %v1234_v54, %v1238_v56  ;;  %v1227_v54 = vld [vmem:[#allocation11 + $0x50] sm:$0xff] }
 0x1ab   :  { %2173 = vmatprep.mubr.msk.bf16.mxu0 %vm2480_vm0, %v2479_v16  ;;  %2158 = vmatpush3.bf16.msra.mxu0 %v2280_v17  ;;  %v1231_v56 = vld [vmem:[#allocation11 + $0x70] sm:$0xff] }
 0x1ac   :  { %2159 = vmatprep.subr.bf16.mxu0 %v2479_v16  ;;  %v1951_v61 = vcombine.high %v1227_v54, %v1231_v56 }
 0x1af   :  { %2160 = vmatpush3.bf16.msra.mxu0 %v2281_v18  ;;  %v1262_v18 = vld [vmem:[#allocation11 + $0x168] sm:$0xff] }
 0x1b0   :  { %2161 = vmatprep.subr.bf16.mxu0 %v2479_v16 }
 0x1b3   :  { %2162 = vmatpush3.bf16.msra.mxu0 %v2282_v19 }
 0x1b4   :  { %2163 = vmatprep.subr.bf16.mxu0 %v2479_v16 }
 0x1b7   :  { %2164 = vmatpush3.bf16.msra.mxu0 %v2283_v20 }
 0x1b8   :  { %2165 = vmatprep.subr.bf16.mxu0 %v2479_v16 }
 0x1bb   :  { %2166 = vmatpush3.bf16.msra.mxu0 %v2284_v21 }
 0x1bc   :  { %2167 = vmatprep.subr.bf16.mxu0 %v2479_v16 }
 0x1bf   :  { %2168 = vmatpush3.bf16.msra.mxu0 %v2285_v22  ;;  %v1265_v22 = vld [vmem:[#allocation11 + $0x180] sm:$0xff] }
 0x1c0   :  { %2169 = vmatprep.subr.bf16.mxu0 %v2479_v16 }
 0x1c3   :  { %2170 = vmatpush3.bf16.msra.mxu0 %v2286_v23  ;;  %v1269_v23 = vld [vmem:[#allocation11 + $0x1a0] sm:$0xff] }
 0x1c4   :  { %2171 = vmatprep.subr.bf16.mxu0 %v2479_v16  ;;  %v1217_v16 = vld [vmem:[#allocation11] sm:$0xff] }
 0x1c5   :  { %v1939_v39 = vcombine.high %v1217_v16, %v1221_v37  ;;  %v1938_v41 = vcombine.low %v1217_v16, %v1221_v37  ;;  %v1219_v37 = vld [vmem:[#allocation11 + $0x10] sm:$0xff] }
 0x1c6   :  { %v1943_v40 = vcombine.high %v1219_v37, %v1223_v38 }
 0x1c7   :  { %2172 = vmatpush3.bf16.msra.mxu0 %v2287_v24  ;;  %1643 = vmatprep.subr.bf16.mxu1 %v1939_v39  ;;  %v1266_v24 = vld [vmem:[#allocation11 + $0x188] sm:$0xff]  ;;  %v1220_v39 = vld [vmem:[#allocation11 + $0x18] sm:$0xff] }
 0x1c8   :  { %1684 = vmatprep.subr.bf16.mxu0 %v1941_v43 }
 0x27d   :  { %v965_v5 = vpop.f32.mrb[8].mxu0 }
 0x27e   :  { %v966_v6 = vadd.f32 %v1908_v4, %v965_v5  ;;  %v2135_v7 = vpop.f32.mrb[9].mxu0  ;;  %v1965_v4 = vcombine.high %v1242_v62, %v1246_v1  ;;  %v1249_v5 = vld [vmem:[#allocation11 + $0x100] sm:$0xff]  ;;  %v1239_v1 = vld [vmem:[#allocation11 + $0xb0] sm:$0xff] }
 0x27f   :  { %v968_v8 = vpop.f32.mrb[10].mxu0  ;;  %v1250_v7 = vld [vmem:[#allocation11 + $0x108] sm:$0xff] }
 0x280   :  { %v1917_v9 = vmul.f32 -1.442695, %v966_v6  ;;  %v2136_v10 = vpop.f32.mrb[11].mxu0 }
 0x282   :  { %2292 = vpow2.f32 %v1917_v9  ;;  %v1254_v9 = vld [vmem:[#allocation11 + $0x128] sm:$0xff] }
 0x28c   :  { %v2293_v11 = vpop.eup %2292 }
 0x28d   :  { %v974_v12 = vadd.f32 1.0, %v2293_v11  ;;  %v1972_v11 = vcombine.low %v1250_v7, %v1254_v9 }
 0x28f   :  { %2294 = vrcp.f32 %v974_v12  ;;  %v1973_v12 = vcombine.high %v1250_v7, %v1254_v9  ;;  %v1247_v9 = vld [vmem:[#allocation11 + $0xf0] sm:$0xff] }
 0x299   :  { %v2295_v13 = vpop.eup %2294 }
 0x29a   :  { %v977_v14 = vmul.f32 %v2295_v13, %v966_v6  ;;  %v1253_v6 = vld [vmem:[#allocation11 + $0x120] sm:$0xff] }
 0x29b   :  { %v1971_v8 = vcombine.high %v1249_v5, %v1253_v6  ;;  %v1970_v10 = vcombine.low %v1249_v5, %v1253_v6  ;;  %v1257_v13 = vld [vmem:[#allocation11 + $0x140] sm:$0xff] }
 0x29c   :  { %v978_v15 = vpack.c.bf16 %v977_v14, %v977_v14  ;;  %v1261_v14 = vld [vmem:[#allocation11 + $0x160] sm:$0xff] }
 0x29d   :  { %v1979_v17 = vcombine.high %v1257_v13, %v1261_v14  ;;  %v1978_v19 = vcombine.low %v1257_v13, %v1261_v14 }
 0x29e   :  { %2154 = vmatmul.mubr.bf16.vlgmr.msra.gmra.mrb[8].mxu1 %v978_v15  ;;  %v1258_v15 = vld [vmem:[#allocation11 + $0x148] sm:$0xff] }
 0x29f   :  { %1675 = vmatprep.mubr.bf16.mxu1 %v2478_v0  ;;  %1644 = vmatpush1.bf16.msra.mxu1 %v1938_v41  ;;  %v1980_v20 = vcombine.low %v1258_v15, %v1262_v18  ;;  %v1981_v21 = vcombine.high %v1258_v15, %v1262_v18  ;;  %v1224_v41 = vld [vmem:[#allocation11 + $0x38] sm:$0xff]  ;;  %v1255_v18 = vld [vmem:[#allocation11 + $0x130] sm:$0xff] }
 0x2a0   :  { %1645 = vmatprep.subr.bf16.mxu1 %v1947_v47  ;;  %v1944_v43 = vcombine.low %v1220_v39, %v1224_v41  ;;  %v1945_v44 = vcombine.high %v1220_v39, %v1224_v41  ;;  %v1275_v39 = vld [vmem:[#allocation11 + $0x1d0] sm:$0xff]  ;;  %v1276_v41 = vld [vmem:[#allocation11 + $0x1d8] sm:$0xff] }
 0x2a3   :  { %1646 = vmatpush1.bf16.msra.mxu1 %v1946_v49 }
 0x2a4   :  { %1647 = vmatprep.subr.bf16.mxu1 %v1955_v55 }
 0x2a7   :  { %1648 = vmatpush1.bf16.msra.mxu1 %v1954_v57  ;;  %v1228_v57 = vld [vmem:[#allocation11 + $0x58] sm:$0xff] }
 0x2a8   :  { %1649 = vmatprep.subr.bf16.mxu1 %v1963_v63  ;;  %v1235_v63 = vld [vmem:[#allocation11 + $0x90] sm:$0xff] }
 0x2a9   :  { %v1959_v6 = vcombine.high %v1235_v63, %v1239_v1 }
 0x2ab   :  { %1650 = vmatpush1.bf16.msra.mxu1 %v1962_v2  ;;  %v1236_v2 = vld [vmem:[#allocation11 + $0x98] sm:$0xff] }
 0x2ac   :  { %1651 = vmatprep.subr.bf16.mxu1 %v1971_v8  ;;  %v1243_v8 = vld [vmem:[#allocation11 + $0xd0] sm:$0xff] }
 0x2ad   :  { %v1967_v14 = vcombine.high %v1243_v8, %v1247_v9 }
 0x2af   :  { %1652 = vmatpush1.bf16.msra.mxu1 %v1970_v10  ;;  %v1244_v10 = vld [vmem:[#allocation11 + $0xd8] sm:$0xff] }
 0x2b0   :  { %1653 = vmatprep.subr.bf16.mxu1 %v1979_v17  ;;  %v1251_v17 = vld [vmem:[#allocation11 + $0x110] sm:$0xff] }
 0x2b3   :  { %1654 = vmatpush1.bf16.msra.mxu1 %v1978_v19  ;;  %v1252_v19 = vld [vmem:[#allocation11 + $0x118] sm:$0xff] }
 0x371   :  { %v1084_v26 = vpop.f32.mrb[8].mxu1 }
 0x372   :  { %v1085_v27 = vadd.f32 %v1918_v25, %v1084_v26  ;;  %v2155_v28 = vpop.f32.mrb[9].mxu1  ;;  %v1987_v25 = vcombine.high %v1265_v22, %v1269_v23  ;;  %v1270_v26 = vld [vmem:[#allocation11 + $0x1a8] sm:$0xff] }
 0x373   :  { %v1087_v29 = vpop.f32.mrb[10].mxu1  ;;  %v1988_v28 = vcombine.low %v1266_v24, %v1270_v26 }
 0x374   :  { %v1927_v30 = vmul.f32 -1.442695, %v1085_v27  ;;  %v2156_v31 = vpop.f32.mrb[11].mxu1  ;;  %v1989_v29 = vcombine.high %v1266_v24, %v1270_v26  ;;  %1655 = vmatprep.subr.bf16.mxu1 %v1987_v25  ;;  %v1259_v24 = vld [vmem:[#allocation11 + $0x150] sm:$0xff]  ;;  %v1260_v26 = vld [vmem:[#allocation11 + $0x158] sm:$0xff] }
 0x375   :  { %v1277_v31 = vld [vmem:[#allocation11 + $0x1e0] sm:$0xff]  ;;  %v1263_v25 = vld [vmem:[#allocation11 + $0x170] sm:$0xff] }
 0x376   :  { %2296 = vpow2.f32 %v1927_v30  ;;  %v1273_v30 = vld [vmem:[#allocation11 + $0x1c0] sm:$0xff] }
 0x380   :  { %v2297_v32 = vpop.eup %2296 }
 0x381   :  { %v1093_v33 = vadd.f32 1.0, %v2297_v32  ;;  %v1274_v32 = vld [vmem:[#allocation11 + $0x1c8] sm:$0xff] }
 0x383   :  { %2298 = vrcp.f32 %v1093_v33  ;;  %v1995_v33 = vcombine.high %v1273_v30, %v1277_v31 }
 0x38d   :  { %v2299_v34 = vpop.eup %2298 }
 0x38e   :  { %v1096_v35 = vmul.f32 %v2299_v34, %v1085_v27  ;;  %v1986_v27 = vcombine.low %v1265_v22, %v1269_v23  ;;  %v1278_v34 = vld [vmem:[#allocation11 + $0x1e8] sm:$0xff]  ;;  %v1975_v23 = vcombine.high %v1251_v17, %v1255_v18 }
 0x38f   :  { %v1997_v16 = vcombine.high %v1274_v32, %v1278_v34 }
 0x390   :  { %v1097_v36 = vpack.c.bf16 %v1096_v35, %v1096_v35  ;;  %1656 = vmatpush1.bf16.msra.mxu1 %v1986_v27  ;;  %v1994_v35 = vcombine.low %v1273_v30, %v1277_v31  ;;  %v1264_v27 = vld [vmem:[#allocation11 + $0x178] sm:$0xff]  ;;  %v1983_v30 = vcombine.high %v1259_v24, %v1263_v25 }
 0x391   :  { %1657 = vmatprep.subr.bf16.mxu1 %v1995_v33  ;;  %v1985_v31 = vcombine.high %v1260_v26, %v1264_v27  ;;  %v1271_v33 = vld [vmem:[#allocation11 + $0x1b0] sm:$0xff] }
 0x392   :  { %2174 = vmatmul.mubr.bf16.vlgmr.msra.gmra.mrb[12].mxu0 %v1097_v36  ;;  %v1996_v36 = vcombine.low %v1274_v32, %v1278_v34  ;;  %v1267_v32 = vld [vmem:[#allocation11 + $0x190] sm:$0xff]  ;;  %v1268_v34 = vld [vmem:[#allocation11 + $0x198] sm:$0xff] }
 0x393   :  { %1716 = vmatprep.mubr.bf16.mxu0 %v2478_v0  ;;  %1685 = vmatpush1.bf16.msra.mxu0 %v1940_v42  ;;  %v1942_v42 = vcombine.low %v1219_v37, %v1223_v38  ;;  %v1991_v37 = vcombine.high %v1267_v32, %v1271_v33 }
 0x394   :  { %1686 = vmatprep.subr.bf16.mxu0 %v1949_v51  ;;  %1658 = vmatpush1.bf16.msra.mxu1 %v1994_v35  ;;  %v1272_v35 = vld [vmem:[#allocation11 + $0x1b8] sm:$0xff] }
 0x395   :  { %1725 = vmatprep.subr.bf16.mxu1 %v1943_v40  ;;  %v1993_v38 = vcombine.high %v1268_v34, %v1272_v35  ;;  %v1279_v40 = vld [vmem:[#allocation11 + $0x1f0] sm:$0xff] }
 0x397   :  { %1687 = vmatpush1.bf16.msra.mxu0 %v1948_v50 }
 0x398   :  { %1688 = vmatprep.subr.bf16.mxu0 %v1957_v59 }
 0x39b   :  { %1689 = vmatpush1.bf16.msra.mxu0 %v1956_v58  ;;  %v1232_v58 = vld [vmem:[#allocation11 + $0x78] sm:$0xff] }
 0x39c   :  { %1690 = vmatprep.subr.bf16.mxu0 %v1965_v4  ;;  %v1953_v62 = vcombine.high %v1228_v57, %v1232_v58  ;;  %v1950_v4 = vcombine.low %v1227_v54, %v1231_v56  ;;  %v1952_v5 = vcombine.low %v1228_v57, %v1232_v58 }
 0x39f   :  { %1691 = vmatpush1.bf16.msra.mxu0 %v1964_v3  ;;  %v1240_v3 = vld [vmem:[#allocation11 + $0xb8] sm:$0xff] }
 0x3a0   :  { %1692 = vmatprep.subr.bf16.mxu0 %v1973_v12  ;;  %v1961_v7 = vcombine.high %v1236_v2, %v1240_v3  ;;  %v1958_v12 = vcombine.low %v1235_v63, %v1239_v1  ;;  %v1960_v13 = vcombine.low %v1236_v2, %v1240_v3 }
 0x3a3   :  { %1693 = vmatpush1.bf16.msra.mxu0 %v1972_v11  ;;  %v1248_v11 = vld [vmem:[#allocation11 + $0xf8] sm:$0xff] }
 0x3a4   :  { %1694 = vmatprep.subr.bf16.mxu0 %v1981_v21  ;;  %v1969_v15 = vcombine.high %v1244_v10, %v1248_v11  ;;  %v1966_v21 = vcombine.low %v1243_v8, %v1247_v9  ;;  %v1968_v22 = vcombine.low %v1244_v10, %v1248_v11 }
 0x3a7   :  { %1695 = vmatpush1.bf16.msra.mxu0 %v1980_v20  ;;  %v1256_v20 = vld [vmem:[#allocation11 + $0x138] sm:$0xff] }
 0x3a8   :  { %1696 = vmatprep.subr.bf16.mxu0 %v1989_v29  ;;  %v1976_v29 = vcombine.low %v1252_v19, %v1256_v20 }
 0x3ab   :  { %1697 = vmatpush1.bf16.msra.mxu0 %v1988_v28  ;;  %v1974_v28 = vcombine.low %v1251_v17, %v1255_v18 }
 0x3ac   :  { %1698 = vmatprep.subr.bf16.mxu0 %v1997_v16  ;;  %v1984_v16 = vcombine.low %v1260_v26, %v1264_v27 }
 0x3af   :  { %1699 = vmatpush1.bf16.msra.mxu0 %v1996_v36  ;;  %v1982_v36 = vcombine.low %v1259_v24, %v1263_v25 }
 0x3b0   :  { %1766 = vmatprep.subr.bf16.mxu0 %v1945_v44  ;;  %v1992_v44 = vcombine.low %v1268_v34, %v1272_v35 }
 0x465   :  { %v1203_v46 = vpop.f32.mrb[12].mxu0 }
 0x466   :  { %v1204_v47 = vadd.f32 %v1928_v45, %v1203_v46  ;;  %v2175_v48 = vpop.f32.mrb[13].mxu0  ;;  %v1999_v45 = vcombine.high %v1275_v39, %v1279_v40 }
 0x467   :  { %v1206_v49 = vpop.f32.mrb[14].mxu0 }
 0x468   :  { %v1937_v50 = vmul.f32 -1.442695, %v1204_v47  ;;  %v2176_v51 = vpop.f32.mrb[15].mxu0  ;;  %v1283_v49 = vlaneseq }
 0x46a   :  { %2300 = vpow2.f32 %v1937_v50  ;;  %v1284_v50 = vshrl.u32 %v1283_v49, 7 }
 0x46c   :  { %v1285_v51 = vsub.s32 0, %v1284_v50  ;;  %v1289_v54 = vsub.s32 1, %v1284_v50  ;;  %v1301_v9 = vsub.s32 4, %v1284_v50  ;;  %v1309_v10 = vsub.s32 6, %v1284_v50 }
 0x46d   :  { %v1305_v11 = vsub.s32 5, %v1284_v50 }
 0x474   :  { %v2301_v52 = vpop.eup %2300 }
 0x475   :  { %v1212_v53 = vadd.f32 1.0, %v2301_v52  ;;  %v1293_v52 = vsub.s32 2, %v1284_v50 }
 0x477   :  { %2302 = vrcp.f32 %v1212_v53  ;;  %v1281_v53 = vld [vmem:[%s2722_s12] sm:$0xff]  ;;  %s2481_s12 = smov [#allocation13]  }
 0x478   :  { %v1286_v56 = vrot.slane %v1281_v53, %v1285_v51  ;;  %v1294_v57 = vrot.slane %v1281_v53, %v1293_v52  ;;  %v1290_v58 = vrot.slane %v1281_v53, %v1289_v54  ;;  %s1821_s15 = sshll.u32 %s2481_s12, 4  ;;  %s1822_s15 = int_to_ptr.vmem [resolvable:$true] %s1821_s15 }
 0x479   :  { %s2436_s20 = scalar_lea.vmem %s1822_s15, 1024  ;;  %p2441_p7 = scmp.lt.s32.totalorder %s1822_s15, %s1822_s15 }
 0x47a   :  { %p2437_p6 = scmp.ne.s32.totalorder %s1822_s15, %s2436_s20  ;;  %p2442_p8 = scmp.lt.s32.totalorder %s2436_s20, %s2436_s20 }
 0x47c   :  { %p2443_p9 = por %p2442_p8, %p2441_p7 }
 0x47e   :  { %p2444_p10 = pnand %p2443_p9, %p2437_p6 }
 0x481   :  { %v2303_v55 = vpop.eup %2302 }
 0x482   :  { %v1215_v59 = vmul.f32 %v2303_v55, %v1204_v47  ;;  %v1998_v47 = vcombine.low %v1275_v39, %v1279_v40  ;;  %v1297_v55 = vsub.s32 3, %v1284_v50 }
 0x484   :  { %v2687_v60 = vpack.c.bf16 %v1215_v59, %v1215_v59  ;;  %v1298_v59 = vrot.slane %v1281_v53, %v1297_v55 }
 0x486   :  { %1676 = vmatmul.mubr.bf16.vlgmr.msra.gmra.mrb[12].mxu1 %v2687_v60  ;;  %1717 = vmatmul.mubr.bf16.vlgmr.msra.gmra.mrb[16].mxu0 %v2687_v60 }
 0x487   :  { %1726 = vmatpush1.bf16.msra.mxu1 %v1942_v42  ;;  %1767 = vmatpush1.bf16.msra.mxu0 %v1944_v43  ;;  %v1280_v42 = vld [vmem:[#allocation11 + $0x1f8] sm:$0xff]  ;;  %v1990_v43 = vcombine.low %v1267_v32, %v1271_v33 }
 0x488   :  { %1727 = vmatprep.subr.bf16.mxu1 %v1951_v61  ;;  %1768 = vmatprep.subr.bf16.mxu0 %v1953_v62  ;;  %v2001_v46 = vcombine.high %v1276_v41, %v1280_v42  ;;  %v2000_v48 = vcombine.low %v1276_v41, %v1280_v42 }
 0x489   :  { %1757 = vmatprep.mubr.bf16.mxu1 %v2478_v0  ;;  %1798 = vmatprep.mubr.bf16.mxu0 %v2478_v0  ;;  %v1977_v0 = vcombine.high %v1252_v19, %v1256_v20 }
 0x48b   :  { %1728 = vmatpush1.bf16.msra.mxu1 %v1950_v4  ;;  %1769 = vmatpush1.bf16.msra.mxu0 %v1952_v5 }
 0x48c   :  { %1729 = vmatprep.subr.bf16.mxu1 %v1959_v6  ;;  %1770 = vmatprep.subr.bf16.mxu0 %v1961_v7 }
 0x48f   :  { %1730 = vmatpush1.bf16.msra.mxu1 %v1958_v12  ;;  %1771 = vmatpush1.bf16.msra.mxu0 %v1960_v13  ;;  %v1313_v12 = vsub.s32 7, %v1284_v50  ;;  %v1302_v13 = vrot.slane %v1281_v53, %v1301_v9 }
 0x490   :  { %1731 = vmatprep.subr.bf16.mxu1 %v1967_v14  ;;  %1772 = vmatprep.subr.bf16.mxu0 %v1969_v15  ;;  %v1310_v14 = vrot.slane %v1281_v53, %v1309_v10  ;;  %v1306_v15 = vrot.slane %v1281_v53, %v1305_v11 }
 0x491   :  { %v1314_v17 = vrot.slane %v1281_v53, %v1313_v12 }
 0x493   :  { %1732 = vmatpush1.bf16.msra.mxu1 %v1966_v21  ;;  %1773 = vmatpush1.bf16.msra.mxu0 %v1968_v22 }
 0x494   :  { %1733 = vmatprep.subr.bf16.mxu1 %v1975_v23  ;;  %1774 = vmatprep.subr.bf16.mxu0 %v1977_v0 }
 0x497   :  { %1734 = vmatpush1.bf16.msra.mxu1 %v1974_v28  ;;  %1775 = vmatpush1.bf16.msra.mxu0 %v1976_v29 }
 0x498   :  { %1735 = vmatprep.subr.bf16.mxu1 %v1983_v30  ;;  %1776 = vmatprep.subr.bf16.mxu0 %v1985_v31 }
 0x49b   :  { %1736 = vmatpush1.bf16.msra.mxu1 %v1982_v36  ;;  %1777 = vmatpush1.bf16.msra.mxu0 %v1984_v16 }
 0x49c   :  { %1737 = vmatprep.subr.bf16.mxu1 %v1991_v37  ;;  %1778 = vmatprep.subr.bf16.mxu0 %v1993_v38 }
 0x49f   :  { %1738 = vmatpush1.bf16.msra.mxu1 %v1990_v43  ;;  %1779 = vmatpush1.bf16.msra.mxu0 %v1992_v44 }
 0x4a0   :  { %1739 = vmatprep.subr.bf16.mxu1 %v1999_v45  ;;  %1780 = vmatprep.subr.bf16.mxu0 %v2001_v46 }
 0x4a3   :  { %1740 = vmatpush1.bf16.msra.mxu1 %v1998_v47  ;;  %1781 = vmatpush1.bf16.msra.mxu0 %v2000_v48 }
 0x4a6   :  { %1758 = vmatmul.mubr.bf16.vlgmr.msra.gmra.mrb[16].mxu1 %v2687_v60  ;;  %1799 = vmatmul.mubr.bf16.vlgmr.msra.gmra.mrb[20].mxu0 %v2687_v60 }
 0x559   :  { %v1677_v61 = vpop.f32.mrb[12].mxu1  ;;  %v1718_v62 = vpop.f32.mrb[16].mxu0 }
 0x55a   :  { %v1678_v63 = vadd.f32 %v1677_v61, %v1286_v56  ;;  %v1719_v1 = vadd.f32 %v1718_v62, %v1294_v57  ;;  %v1679_v2 = vpop.f32.mrb[13].mxu1  ;;  %v1720_v60 = vpop.f32.mrb[17].mxu0 }
 0x55b   :  { %v1680_v3 = vadd.f32 %v1679_v2, %v1290_v58  ;;  %v1721_v4 = vadd.f32 %v1720_v60, %v1298_v59  ;;  %v1681_v5 = vpop.f32.mrb[14].mxu1  ;;  %v1722_v6 = vpop.f32.mrb[18].mxu0 }
 0x55c   :  { %1807 = vst [vmem:[#allocation13] sm:$0xff] %v1678_v63  ;;  %1809 = vst [vmem:[#allocation13 + $0x10] sm:$0xff] %v1719_v1  ;;  %v1682_v7 = vpop.f32.mrb[15].mxu1  ;;  %v1723_v8 = vpop.f32.mrb[19].mxu0 }
 0x55d   :  { %1808 = vst [vmem:[#allocation13 + $0x8] sm:$0xff] %v1680_v3  ;;  %1810 = vst [vmem:[#allocation13 + $0x18] sm:$0xff] %v1721_v4 }
 0x579   :  { %v1759_v18 = vpop.f32.mrb[16].mxu1  ;;  %v1800_v19 = vpop.f32.mrb[20].mxu0 }
 0x57a   :  { %v1760_v20 = vadd.f32 %v1759_v18, %v1302_v13  ;;  %v1801_v21 = vadd.f32 %v1800_v19, %v1310_v14  ;;  %v1761_v22 = vpop.f32.mrb[17].mxu1  ;;  %v1802_v23 = vpop.f32.mrb[21].mxu0 }
 0x57b   :  { %v1762_v0 = vadd.f32 %v1761_v22, %v1306_v15  ;;  %v1803_v24 = vadd.f32 %v1802_v23, %v1314_v17  ;;  %v1763_v25 = vpop.f32.mrb[18].mxu1  ;;  %v1804_v26 = vpop.f32.mrb[22].mxu0 }
 0x57c   :  { %1811 = vst [vmem:[#allocation13 + $0x20] sm:$0xff] %v1760_v20  ;;  %1813 = vst [vmem:[#allocation13 + $0x30] sm:$0xff] %v1801_v21  ;;  %v1764_v27 = vpop.f32.mrb[19].mxu1  ;;  %v1805_v28 = vpop.f32.mrb[23].mxu0 }
 0x57d   :  { %1812 = vst [vmem:[#allocation13 + $0x28] sm:$0xff] %v1762_v0  ;;  %1814 = vst [vmem:[#allocation13 + $0x38] sm:$0xff] %v1803_v24 }
 0x57e   :  { %2447 = shalt.err (!%p2444_p10)
}
 0x57f   :  { %s2448_s24 = scalar_lea.hbm %s2723_s13, 1024 }
 0x580   :  { %p2449_p11 = scmp.ne.s32.totalorder %s2723_s13, %s2448_s24  ;;  %p2452_p12 = scmp.lt.u32.totalorder %s2448_s24, %s2723_s13 }
 0x582   :  { %p2454_p13 = pnand %p2452_p12, %p2449_p11 }
 0x584   :  { %2457 = shalt.err (!%p2454_p13)
}
 0x585   :  { %1824 = dma.vmem_to_hbm [thread:$0]  %s1822_s15, 1024, %s2723_s13, [#allocation4]  }
 0x586   :  { %2466 = dma.done.wait [#allocation4], 1024  }
 0x587   :  { %2467 = vsyncadd [#allocation4], 4294966272 }
 0x588   :  { %1828 = vsyncpa [#allocation3], 1 }
 0x589   :  { %1829 = vsyncpa [#allocation6], 1 }
 0x58a   :  { %1830 = vsyncpa [#allocation9], 1 }
 0x58b   :  { %1831 = vsyncpa [#allocation12], 1 }
 0x58c   :  { %1832 = vsyncpa [#allocation4], 1 }

// kernel: tpu_custom_call.1
= control target key start
LH: loop header
LB: loop body
LE: loop exit
PB: predicated region body
PF: predicated region fallthrough
CT: control target
= control target key end

     0   :  { %18 = vsyncpa [#allocation3], 0  ;;  %s2710_s0 = inlined_call_operand.vmem [shape: f32[8,1], index: 0, kind: input, shape index: {}]   ;;  %s2711_s1 = inlined_call_operand.hbm [shape: bf16[8,1024], index: 1, kind: input, shape index: {}]   ;;  %s2712_s2 = inlined_call_operand.hbm [shape: bf16[1024,128], index: 2, kind: input, shape index: {}]   ;;  %s2713_s3 = inlined_call_operand.vmem [shape: f32[1,128], index: 3, kind: input, shape index: {}]   ;;  %s2714_s4 = inlined_call_operand.vmem [shape: f32[1,128], index: 4, kind: input, shape index: {}]   ;;  %s2715_s5 = inlined_call_operand.hbm [shape: bf16[128,128], index: 5, kind: input, shape index: {}]   ;;  %s2716_s6 = inlined_call_operand.vmem [shape: f32[1,128], index: 6, kind: input, shape index: {}]   ;;  %s2717_s7 = inlined_call_operand.hbm [shape: bf16[128,128], index: 7, kind: input, shape index: {}]   ;;  %s2718_s8 = inlined_call_operand.vmem [shape: f32[1,128], index: 8, kind: input, shape index: {}]   ;;  %s2719_s9 = inlined_call_operand.hbm [shape: bf16[128,128], index: 9, kind: input, shape index: {}]   ;;  %s2720_s10 = inlined_call_operand.vmem [shape: f32[1,128], index: 10, kind: input, shape index: {}]   ;;  %s2721_s11 = inlined_call_operand.hbm [shape: bf16[128,1024], index: 11, kind: input, shape index: {}]   ;;  %s2722_s12 = inlined_call_operand.vmem [shape: f32[1,1024], index: 12, kind: input, shape index: {}]   ;;  %s2723_s13 = inlined_call_operand.hbm [shape: f32[8,1024], index: 13, kind: output, shape index: {}]  }
   0x1   :  { %19 = vsyncpa [#allocation6], 0 }
   0x2   :  { %20 = vsyncpa [#allocation9], 0 }
   0x3   :  { %21 = vsyncpa [#allocation12], 0 }
   0x4   :  { %22 = vsyncpa [#allocation4], 0  ;;  %s2468_s25 = smov [#allocation5]   ;;  %s2304_s29 = scalar_lea.hbm %s2712_s2, 8192 }
   0x5   :  { %s40_s26 = sshll.u32 %s2468_s25, 4  ;;  %p2305_p0 = scmp.ne.s32.totalorder %s2712_s2, %s2304_s29  ;;  %s41_s26 = int_to_ptr.vmem [resolvable:$true] %s40_s26 }
   0x6   :  { %p2308_p1 = scmp.lt.u32.totalorder %s2304_s29, %s2712_s2 }
   0x8   :  { %p2310_p2 = pnand %p2308_p1, %p2305_p0 }
   0xa   :  { %2313 = shalt.err (!%p2310_p2)
}
   0xb   :  { %s2314_s17 = scalar_lea.vmem %s41_s26, 8192  ;;  %p2319_p4 = scmp.lt.s32.totalorder %s41_s26, %s41_s26 }
   0xc   :  { %p2315_p3 = scmp.ne.s32.totalorder %s41_s26, %s2314_s17  ;;  %p2320_p5 = scmp.lt.s32.totalorder %s2314_s17, %s2314_s17 }
   0xe   :  { %p2321_p6 = por %p2320_p5, %p2319_p4 }
  0x10   :  { %p2322_p7 = pnand %p2321_p6, %p2315_p3 }
  0x12   :  { %2325 = shalt.err (!%p2322_p7)
}
  0x13   :  { %s2469_s18 = smov 64   ;;  %s2470_s19 = smov 4  }
  0x14   :  { %46 = dma.hbm_to_vmem [thread:$0]  %s2712_s2, 8192, %s41_s26, [#allocation6], %s2469_s18, %s2469_s18, %s2470_s19  }
  0x15   :  { %s2471_s22 = smov [#allocation8]   ;;  %s2472_s24 = smov [#allocation2]  }
  0x16   :  { %s70_s23 = sshll.u32 %s2471_s22, 4  ;;  %s31_s25 = sshll.u32 %s2472_s24, 4  ;;  %s71_s23 = int_to_ptr.vmem [resolvable:$true] %s70_s23  ;;  %s32_s25 = int_to_ptr.vmem [resolvable:$true] %s31_s25 }
  0x17   :  { %s2326_s29 = scalar_lea.hbm %s2717_s7, 1024 }
  0x18   :  { %p2327_p8 = scmp.ne.s32.totalorder %s2717_s7, %s2326_s29  ;;  %p2330_p9 = scmp.lt.u32.totalorder %s2326_s29, %s2717_s7 }
  0x1a   :  { %p2332_p10 = pnand %p2330_p9, %p2327_p8 }
  0x1c   :  { %2335 = shalt.err (!%p2332_p10)
}
  0x1d   :  { %s2336_s2 = scalar_lea.vmem %s71_s23, 1024  ;;  %p2341_p12 = scmp.lt.s32.totalorder %s71_s23, %s71_s23 }
  0x1e   :  { %p2337_p11 = scmp.ne.s32.totalorder %s71_s23, %s2336_s2  ;;  %p2342_p13 = scmp.lt.s32.totalorder %s2336_s2, %s2336_s2 }
  0x20   :  { %p2343_p0 = por %p2342_p13, %p2341_p12 }
  0x22   :  { %p2344_p1 = pnand %p2343_p0, %p2337_p11 }
  0x24   :  { %2347 = shalt.err (!%p2344_p1)
}
  0x25   :  { %76 = dma.hbm_to_vmem [thread:$0]  %s2717_s7, 1024, %s71_s23, [#allocation9], %s2469_s18, %s2469_s18, %s2470_s19  }
  0x26   :  { %s2348_s22 = scalar_lea.hbm %s2711_s1, 512 }
  0x27   :  { %p2349_p2 = scmp.ne.s32.totalorder %s2711_s1, %s2348_s22  ;;  %p2352_p3 = scmp.lt.u32.totalorder %s2348_s22, %s2711_s1 }
  0x29   :  { %p2354_p4 = pnand %p2352_p3, %p2349_p2 }
  0x2b   :  { %2357 = shalt.err (!%p2354_p4)
}
  0x2c   :  { %s2358_s30 = scalar_lea.vmem %s32_s25, 512  ;;  %p2363_p6 = scmp.lt.s32.totalorder %s32_s25, %s32_s25 }
  0x2d   :  { %p2359_p5 = scmp.ne.s32.totalorder %s32_s25, %s2358_s30  ;;  %p2364_p7 = scmp.lt.s32.totalorder %s2358_s30, %s2358_s30 }
  0x2f   :  { %p2365_p8 = por %p2364_p7, %p2363_p6 }
  0x31   :  { %p2366_p9 = pnand %p2365_p8, %p2359_p5 }
  0x33   :  { %2369 = shalt.err (!%p2366_p9)
}
  0x34   :  { %34 = dma.hbm_to_vmem [thread:$0]  %s2711_s1, 512, %s32_s25, [#allocation3]  }
  0x35   :  { %s2473_s14 = smov [#allocation7]   ;;  %s2474_s16 = smov [#allocation10]  }
  0x36   :  { %s56_s15 = sshll.u32 %s2473_s14, 4  ;;  %s84_s2 = sshll.u32 %s2474_s16, 4  ;;  %s57_s15 = int_to_ptr.vmem [resolvable:$true] %s56_s15  ;;  %s85_s2 = int_to_ptr.vmem [resolvable:$true] %s84_s2 }
  0x37   :  { %s2370_s20 = scalar_lea.hbm %s2715_s5, 1024 }
  0x38   :  { %p2371_p10 = scmp.ne.s32.totalorder %s2715_s5, %s2370_s20  ;;  %p2374_p11 = scmp.lt.u32.totalorder %s2370_s20, %s2715_s5 }
  0x3a   :  { %p2376_p12 = pnand %p2374_p11, %p2371_p10 }
  0x3c   :  { %2379 = shalt.err (!%p2376_p12)
}
  0x3d   :  { %s2380_s1 = scalar_lea.vmem %s57_s15, 1024  ;;  %p2385_p0 = scmp.lt.s32.totalorder %s57_s15, %s57_s15 }
  0x3e   :  { %p2381_p13 = scmp.ne.s32.totalorder %s57_s15, %s2380_s1  ;;  %p2386_p1 = scmp.lt.s32.totalorder %s2380_s1, %s2380_s1 }
  0x40   :  { %p2387_p2 = por %p2386_p1, %p2385_p0 }
  0x42   :  { %p2388_p3 = pnand %p2387_p2, %p2381_p13 }
  0x44   :  { %2391 = shalt.err (!%p2388_p3)
}
  0x45   :  { %62 = dma.hbm_to_vmem [thread:$0]  %s2715_s5, 1024, %s57_s15, [#allocation6], %s2469_s18, %s2469_s18, %s2470_s19  }
  0x46   :  { %s2392_s7 = scalar_lea.hbm %s2719_s9, 1024 }
  0x47   :  { %p2393_p4 = scmp.ne.s32.totalorder %s2719_s9, %s2392_s7  ;;  %p2396_p5 = scmp.lt.u32.totalorder %s2392_s7, %s2719_s9 }
  0x49   :  { %p2398_p6 = pnand %p2396_p5, %p2393_p4 }
  0x4b   :  { %2401 = shalt.err (!%p2398_p6)
}
  0x4c   :  { %s2402_s17 = scalar_lea.vmem %s85_s2, 1024  ;;  %p2407_p8 = scmp.lt.s32.totalorder %s85_s2, %s85_s2 }
  0x4d   :  { %p2403_p7 = scmp.ne.s32.totalorder %s85_s2, %s2402_s17  ;;  %p2408_p9 = scmp.lt.s32.totalorder %s2402_s17, %s2402_s17 }
  0x4f   :  { %p2409_p10 = por %p2408_p9, %p2407_p8 }
  0x51   :  { %p2410_p11 = pnand %p2409_p10, %p2403_p7 }
  0x53   :  { %2413 = shalt.err (!%p2410_p11)
}
  0x54   :  { %90 = dma.hbm_to_vmem [thread:$0]  %s2719_s9, 1024, %s85_s2, [#allocation9], %s2469_s18, %s2469_s18, %s2470_s19  }
  0x55   :  { %s2475_s20 = smov [#allocation11]   ;;  %s2414_s27 = scalar_lea.hbm %s2721_s11, 8192 }
  0x56   :  { %s98_s21 = sshll.u32 %s2475_s20, 4  ;;  %p2415_p12 = scmp.ne.s32.totalorder %s2721_s11, %s2414_s27  ;;  %s99_s21 = int_to_ptr.vmem [resolvable:$true] %s98_s21 }
  0x57   :  { %p2418_p13 = scmp.lt.u32.totalorder %s2414_s27, %s2721_s11 }
  0x59   :  { %p2420_p0 = pnand %p2418_p13, %p2415_p12 }
  0x5b   :  { %2423 = shalt.err (!%p2420_p0)
}
  0x5c   :  { %s2424_s30 = scalar_lea.vmem %s99_s21, 8192  ;;  %p2429_p2 = scmp.lt.s32.totalorder %s99_s21, %s99_s21 }
  0x5d   :  { %p2425_p1 = scmp.ne.s32.totalorder %s99_s21, %s2424_s30  ;;  %p2430_p3 = scmp.lt.s32.totalorder %s2424_s30, %s2424_s30 }
  0x5f   :  { %p2431_p4 = por %p2430_p3, %p2429_p2 }
  0x61   :  { %p2432_p5 = pnand %p2431_p4, %p2425_p1 }
  0x63   :  { %2435 = shalt.err (!%p2432_p5)
}
  0x64   :  { %s2476_s9 = smov 512   ;;  %s2477_s18 = smov 32  }
  0x65   :  { %104 = dma.hbm_to_vmem [thread:$0]  %s2721_s11, 8192, %s99_s21, [#allocation12], %s2476_s9, %s2476_s9, %s2477_s18  }
  0x66   :  { %2458 = dma.done.wait [#allocation3], 512  }
  0x67   :  { %2459 = vsyncadd [#allocation3], 4294966784 }
  0x68   :  { %2460 = dma.done.wait [#allocation6], 9216  }
  0x69   :  { %2461 = vsyncadd [#allocation6], 4294958080 }
  0x6a   :  { %2462 = dma.done.wait [#allocation9], 2048  }
  0x6b   :  { %2463 = vsyncadd [#allocation9], 4294965248 }
  0x6c   :  { %2464 = dma.done.wait [#allocation12], 8192  }
  0x6d   :  { %2465 = vsyncadd [#allocation12], 4294959104  ;;  %v2478_v0 = vmov 0   ;;  %v2192_v1 = vld [vmem:[#allocation5 + $0x40] sm:$0xff]   ;;  %v2196_v5 = vld [vmem:[#allocation5 + $0x48] sm:$0xff]   ;;  %vm2480_vm0 = vmmov 0  }
  0x6e   :  { %2191 = vset.pattern.permute.xlu0 %v2478_v0  ;;  %v2193_v2 = vld [vmem:[#allocation5 + $0xc0] sm:$0xff]   ;;  %2002 = vmatprep.subr.bf16.mxu0 %v2192_v1  ;;  %v2197_v6 = vld [vmem:[#allocation5 + $0xc8] sm:$0xff]   ;;  %v2200_v9 = vld [vmem:[#allocation5 + $0x50] sm:$0xff]  }
  0x6f   :  { %v2194_v3 = vld [vmem:[#allocation5] sm:$0xff]   ;;  %2024 = vmatprep.subr.bf16.mxu1 %v2193_v2  ;;  %v2198_v7 = vld [vmem:[#allocation5 + $0x8] sm:$0xff]   ;;  %v2201_v10 = vld [vmem:[#allocation5 + $0xd0] sm:$0xff]  }
  0x70   :  { %v2195_v4 = vld [vmem:[#allocation5 + $0x80] sm:$0xff]   ;;  %2003 = vmatpush3.bf16.msra.mxu0 %v2194_v3  ;;  %v2199_v8 = vld [vmem:[#allocation5 + $0x88] sm:$0xff]   ;;  %v2202_v11 = vld [vmem:[#allocation5 + $0x10] sm:$0xff]  }
  0x71   :  { %2025 = vmatpush3.bf16.msra.mxu1 %v2195_v4  ;;  %2004 = vmatprep.subr.bf16.mxu0 %v2196_v5  ;;  %v2203_v12 = vld [vmem:[#allocation5 + $0x90] sm:$0xff]   ;;  %v2204_v13 = vld [vmem:[#allocation5 + $0x58] sm:$0xff]   ;;  %v2208_v17 = vld [vmem:[#allocation5 + $0x60] sm:$0xff]  }
  0x72   :  { %2026 = vmatprep.subr.bf16.mxu1 %v2197_v6  ;;  %v2205_v14 = vld [vmem:[#allocation5 + $0xd8] sm:$0xff]   ;;  %v2209_v18 = vld [vmem:[#allocation5 + $0xe0] sm:$0xff]   ;;  %v2212_v21 = vld [vmem:[#allocation5 + $0x68] sm:$0xff]  }
  0x73   :  { %v2206_v15 = vld [vmem:[#allocation5 + $0x18] sm:$0xff]   ;;  %v2210_v19 = vld [vmem:[#allocation5 + $0x20] sm:$0xff]   ;;  %v2213_v22 = vld [vmem:[#allocation5 + $0xe8] sm:$0xff]  }
  0x74   :  { %2005 = vmatpush3.bf16.msra.mxu0 %v2198_v7  ;;  %v2207_v16 = vld [vmem:[#allocation5 + $0x98] sm:$0xff]   ;;  %v2211_v20 = vld [vmem:[#allocation5 + $0xa0] sm:$0xff]   ;;  %v2214_v23 = vld [vmem:[#allocation5 + $0x28] sm:$0xff]  }
  0x75   :  { %2027 = vmatpush3.bf16.msra.mxu1 %v2199_v8  ;;  %2006 = vmatprep.subr.bf16.mxu0 %v2200_v9  ;;  %v2215_v24 = vld [vmem:[#allocation5 + $0xa8] sm:$0xff]   ;;  %v2216_v25 = vld [vmem:[#allocation5 + $0x70] sm:$0xff]   ;;  %v2220_v29 = vld [vmem:[#allocation5 + $0x78] sm:$0xff]  }
  0x76   :  { %2028 = vmatprep.subr.bf16.mxu1 %v2201_v10  ;;  %v2217_v26 = vld [vmem:[#allocation5 + $0xf0] sm:$0xff]   ;;  %v2221_v30 = vld [vmem:[#allocation5 + $0xf8] sm:$0xff]   ;;  %v126_v33 = vld [vmem:[#allocation2] sm:$0xff] }
  0x77   :  { %v2218_v27 = vld [vmem:[#allocation5 + $0x30] sm:$0xff]   ;;  %v2222_v31 = vld [vmem:[#allocation5 + $0x38] sm:$0xff]   ;;  %v127_v34 = vld [vmem:[#allocation2 + $0x8] sm:$0xff]  ;;  %v1834_v35 = vcombine.low %v126_v33, %v126_v33  ;;  %v1835_v36 = vcombine.high %v126_v33, %v126_v33 }
  0x78   :  { %2007 = vmatpush3.bf16.msra.mxu0 %v2202_v11  ;;  %v2219_v28 = vld [vmem:[#allocation5 + $0xb0] sm:$0xff]   ;;  %v2223_v32 = vld [vmem:[#allocation5 + $0xb8] sm:$0xff]   ;;  %v1836_v37 = vcombine.low %v127_v34, %v127_v34  ;;  %v1837_v38 = vcombine.high %v127_v34, %v127_v34  ;;  %v2228_v39 = vld [vmem:[#allocation5 + $0x140] sm:$0xff]  }
  0x79   :  { %2029 = vmatpush3.bf16.msra.mxu1 %v2203_v12  ;;  %2008 = vmatprep.subr.bf16.mxu0 %v2204_v13  ;;  %v2229_v40 = vld [vmem:[#allocation5 + $0x1c0] sm:$0xff]   ;;  %v2232_v43 = vld [vmem:[#allocation5 + $0x148] sm:$0xff]   ;;  %v2236_v47 = vld [vmem:[#allocation5 + $0x150] sm:$0xff]  }
  0x7a   :  { %2030 = vmatprep.subr.bf16.mxu1 %v2205_v14  ;;  %716 = vmatprep.mubr.bf16.mxu0 %v1835_v36  ;;  %v2230_v41 = vld [vmem:[#allocation5 + $0x100] sm:$0xff]   ;;  %v2233_v44 = vld [vmem:[#allocation5 + $0x1c8] sm:$0xff]   ;;  %v2237_v48 = vld [vmem:[#allocation5 + $0x1d0] sm:$0xff]  }
  0x7b   :  { %756 = vmatprep.mubr.bf16.mxu1 %v1837_v38  ;;  %v2231_v42 = vld [vmem:[#allocation5 + $0x180] sm:$0xff]   ;;  %v2234_v45 = vld [vmem:[#allocation5 + $0x108] sm:$0xff]   ;;  %v2238_v49 = vld [vmem:[#allocation5 + $0x110] sm:$0xff]  }
  0x7c   :  { %2009 = vmatpush3.bf16.msra.mxu0 %v2206_v15  ;;  %v2235_v46 = vld [vmem:[#allocation5 + $0x188] sm:$0xff]   ;;  %v2239_v50 = vld [vmem:[#allocation5 + $0x190] sm:$0xff]   ;;  %v2240_v51 = vld [vmem:[#allocation5 + $0x158] sm:$0xff]  }
  0x7d   :  { %2031 = vmatpush3.bf16.msra.mxu1 %v2207_v16  ;;  %2010 = vmatprep.subr.bf16.mxu0 %v2208_v17  ;;  %v2241_v52 = vld [vmem:[#allocation5 + $0x1d8] sm:$0xff]   ;;  %v2244_v55 = vld [vmem:[#allocation5 + $0x160] sm:$0xff]   ;;  %v2248_v59 = vld [vmem:[#allocation5 + $0x168] sm:$0xff]   ;;  %v2479_v16 = vmov 0.0  }
  0x7e   :  { %2032 = vmatprep.subr.bf16.mxu1 %v2209_v18  ;;  %v2242_v53 = vld [vmem:[#allocation5 + $0x118] sm:$0xff]   ;;  %v2245_v56 = vld [vmem:[#allocation5 + $0x1e0] sm:$0xff]   ;;  %v2249_v60 = vld [vmem:[#allocation5 + $0x1e8] sm:$0xff]  }
  0x7f   :  { %v2243_v54 = vld [vmem:[#allocation5 + $0x198] sm:$0xff]   ;;  %v2246_v57 = vld [vmem:[#allocation5 + $0x120] sm:$0xff]   ;;  %v2250_v61 = vld [vmem:[#allocation5 + $0x128] sm:$0xff]  }
  0x80   :  { %2011 = vmatpush3.bf16.msra.mxu0 %v2210_v19  ;;  %v2247_v58 = vld [vmem:[#allocation5 + $0x1a0] sm:$0xff]   ;;  %v2251_v62 = vld [vmem:[#allocation5 + $0x1a8] sm:$0xff]   ;;  %v2252_v63 = vld [vmem:[#allocation5 + $0x170] sm:$0xff]  }
  0x81   :  { %2033 = vmatpush3.bf16.msra.mxu1 %v2211_v20  ;;  %2012 = vmatprep.subr.bf16.mxu0 %v2212_v21  ;;  %v2253_v1 = vld [vmem:[#allocation5 + $0x1f0] sm:$0xff]   ;;  %v2256_v4 = vld [vmem:[#allocation5 + $0x178] sm:$0xff]   ;;  %v2264_v15 = vld [vmem:[#allocation7] sm:$0xff]  }
  0x82   :  { %2034 = vmatprep.subr.bf16.mxu1 %v2213_v22  ;;  %v2254_v2 = vld [vmem:[#allocation5 + $0x130] sm:$0xff]   ;;  %v2257_v5 = vld [vmem:[#allocation5 + $0x1f8] sm:$0xff]   ;;  %v2265_v17 = vld [vmem:[#allocation7 + $0x8] sm:$0xff]  }
  0x83   :  { %v2255_v3 = vld [vmem:[#allocation5 + $0x1b0] sm:$0xff]   ;;  %v2258_v6 = vld [vmem:[#allocation5 + $0x138] sm:$0xff]   ;;  %v2268_v20 = vld [vmem:[#allocation7 + $0x20] sm:$0xff]  }
  0x84   :  { %2013 = vmatpush3.bf16.msra.mxu0 %v2214_v23  ;;  %v2259_v7 = vld [vmem:[#allocation5 + $0x1b8] sm:$0xff]   ;;  %v128_v8 = vld [vmem:[#allocation2 + $0x10] sm:$0xff]  ;;  %v2269_v21 = vld [vmem:[#allocation7 + $0x28] sm:$0xff]  }
  0x85   :  { %2035 = vmatpush3.bf16.msra.mxu1 %v2215_v24  ;;  %2014 = vmatprep.subr.bf16.mxu0 %v2216_v25  ;;  %v1838_v9 = vcombine.low %v128_v8, %v128_v8  ;;  %v1839_v10 = vcombine.high %v128_v8, %v128_v8  ;;  %v129_v11 = vld [vmem:[#allocation2 + $0x18] sm:$0xff]  ;;  %v2266_v18 = vld [vmem:[#allocation7 + $0x10] sm:$0xff]  }
  0x86   :  { %2036 = vmatprep.subr.bf16.mxu1 %v2217_v26  ;;  %v130_v12 = vld [vmem:[%s2710_s0] sm:$0xff]  ;;  %v1840_v13 = vcombine.low %v129_v11, %v129_v11  ;;  %v1841_v14 = vcombine.high %v129_v11, %v129_v11  ;;  %v2270_v22 = vld [vmem:[#allocation7 + $0x30] sm:$0xff]  }
  0x87   :  { %262 = vperm.xlu0 %2191, %v130_v12   ;;  %v2267_v19 = vld [vmem:[#allocation7 + $0x18] sm:$0xff]  }
  0x88   :  { %2015 = vmatpush3.bf16.msra.mxu0 %v2218_v27  ;;  %v2271_v23 = vld [vmem:[#allocation7 + $0x38] sm:$0xff]  }
  0x89   :  { %2037 = vmatpush3.bf16.msra.mxu1 %v2219_v28  ;;  %2016 = vmatprep.subr.bf16.mxu0 %v2220_v29  ;;  %v1833_v24 = vld [vmem:[%s2713_s3] ss:$0 sm:$0xff] }
  0x8a   :  { %2038 = vmatprep.subr.bf16.mxu1 %v2221_v30 }
  0x8c   :  { %2017 = vmatpush3.bf16.msra.mxu0 %v2222_v31 }
  0x8d   :  { %2039 = vmatpush3.bf16.msra.mxu1 %v2223_v32  ;;  %2046 = vmatprep.subr.bf16.mxu0 %v2228_v39 }
  0x8e   :  { %2068 = vmatprep.subr.bf16.mxu1 %v2229_v40 }
  0x8f   :  { %717 = vmatmul.mubr.bf16.vlgmr.msra.gmra.mrb[0].mxu0 %v1834_v35 }
  0x90   :  { %757 = vmatmul.mubr.bf16.vlgmr.msra.gmra.mrb[0].mxu1 %v1836_v37  ;;  %2047 = vmatpush3.bf16.msra.mxu0 %v2230_v41 }
  0x91   :  { %2069 = vmatpush3.bf16.msra.mxu1 %v2231_v42  ;;  %2048 = vmatprep.subr.bf16.mxu0 %v2232_v43 }
  0x92   :  { %2070 = vmatprep.subr.bf16.mxu1 %v2233_v44  ;;  %796 = vmatprep.mubr.bf16.mxu0 %v1839_v10 }
  0x93   :  { %836 = vmatprep.mubr.bf16.mxu1 %v1841_v14 }
  0x94   :  { %2049 = vmatpush3.bf16.msra.mxu0 %v2234_v45 }
  0x95   :  { %2071 = vmatpush3.bf16.msra.mxu1 %v2235_v46  ;;  %2050 = vmatprep.subr.bf16.mxu0 %v2236_v47 }
  0x96   :  { %2072 = vmatprep.subr.bf16.mxu1 %v2237_v48 }
  0x98   :  { %2051 = vmatpush3.bf16.msra.mxu0 %v2238_v49 }
  0x99   :  { %2073 = vmatpush3.bf16.msra.mxu1 %v2239_v50  ;;  %2052 = vmatprep.subr.bf16.mxu0 %v2240_v51  ;;  %v1906_v50 = vld [vmem:[%s2714_s4] ss:$0 sm:$0xff] }
  0x9a   :  { %2074 = vmatprep.subr.bf16.mxu1 %v2241_v52 }
  0x9c   :  { %2053 = vmatpush3.bf16.msra.mxu0 %v2242_v53 }
  0x9d   :  { %2075 = vmatpush3.bf16.msra.mxu1 %v2243_v54  ;;  %2054 = vmatprep.subr.bf16.mxu0 %v2244_v55 }
  0x9e   :  { %2076 = vmatprep.subr.bf16.mxu1 %v2245_v56 }
  0xa0   :  { %2055 = vmatpush3.bf16.msra.mxu0 %v2246_v57 }
  0xa1   :  { %2077 = vmatpush3.bf16.msra.mxu1 %v2247_v58  ;;  %2056 = vmatprep.subr.bf16.mxu0 %v2248_v59  ;;  %v2272_v59 = vld [vmem:[#allocation8] sm:$0xff]  }
  0xa2   :  { %2078 = vmatprep.subr.bf16.mxu1 %v2249_v60  ;;  %v2273_v60 = vld [vmem:[#allocation8 + $0x8] sm:$0xff]  }
  0xa4   :  { %2057 = vmatpush3.bf16.msra.mxu0 %v2250_v61  ;;  %v2274_v61 = vld [vmem:[#allocation8 + $0x10] sm:$0xff]  }
  0xa5   :  { %2079 = vmatpush3.bf16.msra.mxu1 %v2251_v62  ;;  %2058 = vmatprep.subr.bf16.mxu0 %v2252_v63  ;;  %v2275_v62 = vld [vmem:[#allocation8 + $0x18] sm:$0xff]   ;;  %v2276_v63 = vld [vmem:[#allocation8 + $0x20] sm:$0xff]  }
  0xa6   :  { %2080 = vmatprep.subr.bf16.mxu1 %v2253_v1  ;;  %v2277_v1 = vld [vmem:[#allocation8 + $0x28] sm:$0xff]  }
  0xa8   :  { %2059 = vmatpush3.bf16.msra.mxu0 %v2254_v2  ;;  %v2278_v2 = vld [vmem:[#allocation8 + $0x30] sm:$0xff]  }
  0xa9   :  { %2081 = vmatpush3.bf16.msra.mxu1 %v2255_v3  ;;  %2060 = vmatprep.subr.bf16.mxu0 %v2256_v4  ;;  %v2279_v3 = vld [vmem:[#allocation8 + $0x38] sm:$0xff]  }
  0xaa   :  { %2082 = vmatprep.subr.bf16.mxu1 %v2257_v5  ;;  %v1908_v4 = vld [vmem:[%s2716_s6] ss:$0 sm:$0xff] }
  0xac   :  { %2061 = vmatpush3.bf16.msra.mxu0 %v2258_v6 }
  0xad   :  { %2083 = vmatpush3.bf16.msra.mxu1 %v2259_v7  ;;  %2117 = vmatprep.subr.bf16.mxu0 %v2479_v16 }
  0xae   :  { %2137 = vmatprep.subr.bf16.mxu1 %v2479_v16 }
  0xaf   :  { %797 = vmatmul.mubr.bf16.vlgmr.msra.gmra.mrb[4].mxu0 %v1838_v9 }
  0xb0   :  { %837 = vmatmul.mubr.bf16.vlgmr.msra.gmra.mrb[4].mxu1 %v1840_v13  ;;  %2118 = vmatpush3.bf16.msra.mxu0 %v2264_v15 }
  0xb1   :  { %2119 = vmatprep.subr.bf16.mxu0 %v2479_v16  ;;  %2133 = vmatprep.mubr.msk.bf16.mxu0 %vm2480_vm0, %v2479_v16 }
  0xb2   :  { %2153 = vmatprep.mubr.msk.bf16.mxu1 %vm2480_vm0, %v2479_v16  ;;  %2138 = vmatpush3.bf16.msra.mxu1 %v2272_v59 }
  0xb3   :  { %2139 = vmatprep.subr.bf16.mxu1 %v2479_v16 }
  0xb4   :  { %2120 = vmatpush3.bf16.msra.mxu0 %v2265_v17  ;;  %v2280_v17 = vld [vmem:[#allocation10] sm:$0xff]  }
  0xb5   :  { %2121 = vmatprep.subr.bf16.mxu0 %v2479_v16 }
  0xb6   :  { %2140 = vmatpush3.bf16.msra.mxu1 %v2273_v60  ;;  %v1241_v60 = vld [vmem:[#allocation11 + $0xc0] sm:$0xff] }
  0xb7   :  { %2141 = vmatprep.subr.bf16.mxu1 %v2479_v16 }
  0xb8   :  { %2122 = vmatpush3.bf16.msra.mxu0 %v2266_v18  ;;  %v2281_v18 = vld [vmem:[#allocation10 + $0x8] sm:$0xff]  }
  0xb9   :  { %2123 = vmatprep.subr.bf16.mxu0 %v2479_v16 }
  0xba   :  { %2142 = vmatpush3.bf16.msra.mxu1 %v2274_v61  ;;  %v1245_v61 = vld [vmem:[#allocation11 + $0xe0] sm:$0xff] }
  0xbb   :  { %2143 = vmatprep.subr.bf16.mxu1 %v2479_v16 }
  0xbc   :  { %2124 = vmatpush3.bf16.msra.mxu0 %v2267_v19  ;;  %v2282_v19 = vld [vmem:[#allocation10 + $0x10] sm:$0xff]  }
  0xbd   :  { %2125 = vmatprep.subr.bf16.mxu0 %v2479_v16 }
  0xbe   :  { %2144 = vmatpush3.bf16.msra.mxu1 %v2275_v62  ;;  %v1242_v62 = vld [vmem:[#allocation11 + $0xc8] sm:$0xff] }
  0xbf   :  { %2145 = vmatprep.subr.bf16.mxu1 %v2479_v16 }
  0xc0   :  { %2126 = vmatpush3.bf16.msra.mxu0 %v2268_v20  ;;  %v2283_v20 = vld [vmem:[#allocation10 + $0x18] sm:$0xff]  }
  0xc1   :  { %2127 = vmatprep.subr.bf16.mxu0 %v2479_v16 }
  0xc2   :  { %2146 = vmatpush3.bf16.msra.mxu1 %v2276_v63  ;;  %v1963_v63 = vcombine.high %v1241_v60, %v1245_v61 }
  0xc3   :  { %2147 = vmatprep.subr.bf16.mxu1 %v2479_v16 }
  0xc4   :  { %2128 = vmatpush3.bf16.msra.mxu0 %v2269_v21  ;;  %v2284_v21 = vld [vmem:[#allocation10 + $0x20] sm:$0xff]  }
  0xc5   :  { %2129 = vmatprep.subr.bf16.mxu0 %v2479_v16 }
  0xc6   :  { %2148 = vmatpush3.bf16.msra.mxu1 %v2277_v1  ;;  %v1246_v1 = vld [vmem:[#allocation11 + $0xe8] sm:$0xff] }
  0xc7   :  { %2149 = vmatprep.subr.bf16.mxu1 %v2479_v16 }
  0xc8   :  { %2130 = vmatpush3.bf16.msra.mxu0 %v2270_v22  ;;  %v2285_v22 = vld [vmem:[#allocation10 + $0x28] sm:$0xff]  }
  0xc9   :  { %2131 = vmatprep.subr.bf16.mxu0 %v2479_v16 }
  0xca   :  { %2150 = vmatpush3.bf16.msra.mxu1 %v2278_v2  ;;  %v1962_v2 = vcombine.low %v1241_v60, %v1245_v61 }
  0xcb   :  { %2151 = vmatprep.subr.bf16.mxu1 %v2479_v16 }
  0xcc   :  { %2132 = vmatpush3.bf16.msra.mxu0 %v2271_v23  ;;  %v2286_v23 = vld [vmem:[#allocation10 + $0x30] sm:$0xff]  }
  0xcd   :  { %2157 = vmatprep.subr.bf16.mxu0 %v2479_v16 }
  0xce   :  { %2152 = vmatpush3.bf16.msra.mxu1 %v2279_v3  ;;  %v1964_v3 = vcombine.low %v1242_v62, %v1246_v1 }
 0x106   :  { %v263_v25 = vpop.permute.xlu0 %262 }
 0x107   :  { %v271_v28 = vmul.f32 %v1833_v24, %v263_v25  ;;  %v2287_v24 = vld [vmem:[#allocation10 + $0x38] sm:$0xff]  }
 0x108   :  { %v1918_v25 = vld [vmem:[%s2718_s8] ss:$0 sm:$0xff] }
 0x162   :  { %v2018_v26 = vpop.f32.mrb[0].mxu0 }
 0x163   :  { %v2040_v27 = vpop.f32.mrb[0].mxu1  ;;  %v2019_v29 = vpop.f32.mrb[1].mxu0 }
 0x164   :  { %v2041_v30 = vpop.f32.mrb[1].mxu1  ;;  %v2020_v31 = vadd.f32 %v2019_v29, %v2018_v26  ;;  %v2021_v33 = vpop.f32.mrb[2].mxu0 }
 0x165   :  { %v2042_v32 = vadd.f32 %v2041_v30, %v2040_v27  ;;  %v2043_v34 = vpop.f32.mrb[2].mxu1  ;;  %v2022_v35 = vpop.f32.mrb[3].mxu0 }
 0x166   :  { %v2044_v36 = vpop.f32.mrb[3].mxu1  ;;  %v719_v37 = vadd.f32 %v2020_v31, %v271_v28 }
 0x168   :  { %v759_v38 = vadd.f32 %v2042_v32, %v719_v37  ;;  %v1221_v37 = vld [vmem:[#allocation11 + $0x20] sm:$0xff] }
 0x182   :  { %v2062_v39 = vpop.f32.mrb[4].mxu0 }
 0x183   :  { %v2084_v40 = vpop.f32.mrb[4].mxu1  ;;  %v2063_v41 = vpop.f32.mrb[5].mxu0 }
 0x184   :  { %v2085_v42 = vpop.f32.mrb[5].mxu1  ;;  %v2064_v43 = vadd.f32 %v2063_v41, %v2062_v39  ;;  %v2065_v45 = vpop.f32.mrb[6].mxu0 }
 0x185   :  { %v2086_v44 = vadd.f32 %v2085_v42, %v2084_v40  ;;  %v2087_v46 = vpop.f32.mrb[6].mxu1  ;;  %v2066_v47 = vpop.f32.mrb[7].mxu0  ;;  %v1222_v40 = vld [vmem:[#allocation11 + $0x28] sm:$0xff]  ;;  %v1229_v45 = vld [vmem:[#allocation11 + $0x60] sm:$0xff] }
 0x186   :  { %v2088_v48 = vpop.f32.mrb[7].mxu1  ;;  %v799_v49 = vadd.f32 %v2064_v43, %v759_v38  ;;  %v1218_v38 = vld [vmem:[#allocation11 + $0x8] sm:$0xff] }
 0x187   :  { %v1940_v42 = vcombine.low %v1218_v38, %v1222_v40  ;;  %v1941_v43 = vcombine.high %v1218_v38, %v1222_v40  ;;  %v1226_v46 = vld [vmem:[#allocation11 + $0x48] sm:$0xff]  ;;  %v1223_v38 = vld [vmem:[#allocation11 + $0x30] sm:$0xff] }
 0x188   :  { %v839_v51 = vadd.f32 %v2086_v44, %v799_v49  ;;  %v1225_v44 = vld [vmem:[#allocation11 + $0x40] sm:$0xff]  ;;  %v1230_v48 = vld [vmem:[#allocation11 + $0x68] sm:$0xff] }
 0x189   :  { %v1947_v47 = vcombine.high %v1225_v44, %v1229_v45  ;;  %v1946_v49 = vcombine.low %v1225_v44, %v1229_v45  ;;  %v1928_v45 = vld [vmem:[%s2720_s10] ss:$0 sm:$0xff] }
 0x18a   :  { %v851_v52 = vadd.f32 %v1906_v50, %v839_v51  ;;  %v1948_v50 = vcombine.low %v1226_v46, %v1230_v48  ;;  %v1949_v51 = vcombine.high %v1226_v46, %v1230_v48 }
 0x18c   :  { %v1907_v53 = vmul.f32 -1.442695, %v851_v52 }
 0x18e   :  { %2288 = vpow2.f32 %v1907_v53  ;;  %v1237_v53 = vld [vmem:[#allocation11 + $0xa0] sm:$0xff] }
 0x198   :  { %v2289_v54 = vpop.eup %2288 }
 0x199   :  { %v855_v55 = vadd.f32 1.0, %v2289_v54  ;;  %v1234_v54 = vld [vmem:[#allocation11 + $0x88] sm:$0xff] }
 0x19b   :  { %2290 = vrcp.f32 %v855_v55 }
 0x1a5   :  { %v2291_v56 = vpop.eup %2290 }
 0x1a6   :  { %v858_v57 = vmul.f32 %v2291_v56, %v851_v52  ;;  %v1233_v52 = vld [vmem:[#allocation11 + $0x80] sm:$0xff]  ;;  %v1238_v56 = vld [vmem:[#allocation11 + $0xa8] sm:$0xff] }
 0x1a7   :  { %v1955_v55 = vcombine.high %v1233_v52, %v1237_v53  ;;  %v1957_v59 = vcombine.high %v1234_v54, %v1238_v56 }
 0x1a8   :  { %v859_v58 = vpack.c.bf16 %v858_v57, %v858_v57  ;;  %v1954_v57 = vcombine.low %v1233_v52, %v1237_v53 }
 0x1aa   :  { %2134 = vmatmul.mubr.bf16.vlgmr.msra.gmra.mrb[8].mxu0 %v859_v58  ;;  %v1956_v58 = vcombine.low %v1234_v54, %v1238_v56  ;;  %v1227_v54 = vld [vmem:[#allocation11 + $0x50] sm:$0xff] }
 0x1ab   :  { %2173 = vmatprep.mubr.msk.bf16.mxu0 %vm2480_vm0, %v2479_v16  ;;  %2158 = vmatpush3.bf16.msra.mxu0 %v2280_v17  ;;  %v1231_v56 = vld [vmem:[#allocation11 + $0x70] sm:$0xff] }
 0x1ac   :  { %2159 = vmatprep.subr.bf16.mxu0 %v2479_v16  ;;  %v1951_v61 = vcombine.high %v1227_v54, %v1231_v56 }
 0x1af   :  { %2160 = vmatpush3.bf16.msra.mxu0 %v2281_v18  ;;  %v1262_v18 = vld [vmem:[#allocation11 + $0x168] sm:$0xff] }
 0x1b0   :  { %2161 = vmatprep.subr.bf16.mxu0 %v2479_v16 }
 0x1b3   :  { %2162 = vmatpush3.bf16.msra.mxu0 %v2282_v19 }
 0x1b4   :  { %2163 = vmatprep.subr.bf16.mxu0 %v2479_v16 }
 0x1b7   :  { %2164 = vmatpush3.bf16.msra.mxu0 %v2283_v20 }
 0x1b8   :  { %2165 = vmatprep.subr.bf16.mxu0 %v2479_v16 }
 0x1bb   :  { %2166 = vmatpush3.bf16.msra.mxu0 %v2284_v21 }
 0x1bc   :  { %2167 = vmatprep.subr.bf16.mxu0 %v2479_v16 }
 0x1bf   :  { %2168 = vmatpush3.bf16.msra.mxu0 %v2285_v22  ;;  %v1265_v22 = vld [vmem:[#allocation11 + $0x180] sm:$0xff] }
 0x1c0   :  { %2169 = vmatprep.subr.bf16.mxu0 %v2479_v16 }
 0x1c3   :  { %2170 = vmatpush3.bf16.msra.mxu0 %v2286_v23  ;;  %v1269_v23 = vld [vmem:[#allocation11 + $0x1a0] sm:$0xff] }
 0x1c4   :  { %2171 = vmatprep.subr.bf16.mxu0 %v2479_v16  ;;  %v1217_v16 = vld [vmem:[#allocation11] sm:$0xff] }
 0x1c5   :  { %v1939_v39 = vcombine.high %v1217_v16, %v1221_v37  ;;  %v1938_v41 = vcombine.low %v1217_v16, %v1221_v37  ;;  %v1219_v37 = vld [vmem:[#allocation11 + $0x10] sm:$0xff] }
 0x1c6   :  { %v1943_v40 = vcombine.high %v1219_v37, %v1223_v38 }
 0x1c7   :  { %2172 = vmatpush3.bf16.msra.mxu0 %v2287_v24  ;;  %1643 = vmatprep.subr.bf16.mxu1 %v1939_v39  ;;  %v1266_v24 = vld [vmem:[#allocation11 + $0x188] sm:$0xff]  ;;  %v1220_v39 = vld [vmem:[#allocation11 + $0x18] sm:$0xff] }
 0x1c8   :  { %1684 = vmatprep.subr.bf16.mxu0 %v1941_v43 }
 0x27d   :  { %v965_v5 = vpop.f32.mrb[8].mxu0 }
 0x27e   :  { %v966_v6 = vadd.f32 %v1908_v4, %v965_v5  ;;  %v2135_v7 = vpop.f32.mrb[9].mxu0  ;;  %v1965_v4 = vcombine.high %v1242_v62, %v1246_v1  ;;  %v1249_v5 = vld [vmem:[#allocation11 + $0x100] sm:$0xff]  ;;  %v1239_v1 = vld [vmem:[#allocation11 + $0xb0] sm:$0xff] }
 0x27f   :  { %v968_v8 = vpop.f32.mrb[10].mxu0  ;;  %v1250_v7 = vld [vmem:[#allocation11 + $0x108] sm:$0xff] }
 0x280   :  { %v1917_v9 = vmul.f32 -1.442695, %v966_v6  ;;  %v2136_v10 = vpop.f32.mrb[11].mxu0 }
 0x282   :  { %2292 = vpow2.f32 %v1917_v9  ;;  %v1254_v9 = vld [vmem:[#allocation11 + $0x128] sm:$0xff] }
 0x28c   :  { %v2293_v11 = vpop.eup %2292 }
 0x28d   :  { %v974_v12 = vadd.f32 1.0, %v2293_v11  ;;  %v1972_v11 = vcombine.low %v1250_v7, %v1254_v9 }
 0x28f   :  { %2294 = vrcp.f32 %v974_v12  ;;  %v1973_v12 = vcombine.high %v1250_v7, %v1254_v9  ;;  %v1247_v9 = vld [vmem:[#allocation11 + $0xf0] sm:$0xff] }
 0x299   :  { %v2295_v13 = vpop.eup %2294 }
 0x29a   :  { %v977_v14 = vmul.f32 %v2295_v13, %v966_v6  ;;  %v1253_v6 = vld [vmem:[#allocation11 + $0x120] sm:$0xff] }
 0x29b   :  { %v1971_v8 = vcombine.high %v1249_v5, %v1253_v6  ;;  %v1970_v10 = vcombine.low %v1249_v5, %v1253_v6  ;;  %v1257_v13 = vld [vmem:[#allocation11 + $0x140] sm:$0xff] }
 0x29c   :  { %v978_v15 = vpack.c.bf16 %v977_v14, %v977_v14  ;;  %v1261_v14 = vld [vmem:[#allocation11 + $0x160] sm:$0xff] }
 0x29d   :  { %v1979_v17 = vcombine.high %v1257_v13, %v1261_v14  ;;  %v1978_v19 = vcombine.low %v1257_v13, %v1261_v14 }
 0x29e   :  { %2154 = vmatmul.mubr.bf16.vlgmr.msra.gmra.mrb[8].mxu1 %v978_v15  ;;  %v1258_v15 = vld [vmem:[#allocation11 + $0x148] sm:$0xff] }
 0x29f   :  { %1675 = vmatprep.mubr.bf16.mxu1 %v2478_v0  ;;  %1644 = vmatpush1.bf16.msra.mxu1 %v1938_v41  ;;  %v1980_v20 = vcombine.low %v1258_v15, %v1262_v18  ;;  %v1981_v21 = vcombine.high %v1258_v15, %v1262_v18  ;;  %v1224_v41 = vld [vmem:[#allocation11 + $0x38] sm:$0xff]  ;;  %v1255_v18 = vld [vmem:[#allocation11 + $0x130] sm:$0xff] }
 0x2a0   :  { %1645 = vmatprep.subr.bf16.mxu1 %v1947_v47  ;;  %v1944_v43 = vcombine.low %v1220_v39, %v1224_v41  ;;  %v1945_v44 = vcombine.high %v1220_v39, %v1224_v41  ;;  %v1275_v39 = vld [vmem:[#allocation11 + $0x1d0] sm:$0xff]  ;;  %v1276_v41 = vld [vmem:[#allocation11 + $0x1d8] sm:$0xff] }
 0x2a3   :  { %1646 = vmatpush1.bf16.msra.mxu1 %v1946_v49 }
 0x2a4   :  { %1647 = vmatprep.subr.bf16.mxu1 %v1955_v55 }
 0x2a7   :  { %1648 = vmatpush1.bf16.msra.mxu1 %v1954_v57  ;;  %v1228_v57 = vld [vmem:[#allocation11 + $0x58] sm:$0xff] }
 0x2a8   :  { %1649 = vmatprep.subr.bf16.mxu1 %v1963_v63  ;;  %v1235_v63 = vld [vmem:[#allocation11 + $0x90] sm:$0xff] }
 0x2a9   :  { %v1959_v6 = vcombine.high %v1235_v63, %v1239_v1 }
 0x2ab   :  { %1650 = vmatpush1.bf16.msra.mxu1 %v1962_v2  ;;  %v1236_v2 = vld [vmem:[#allocation11 + $0x98] sm:$0xff] }
 0x2ac   :  { %1651 = vmatprep.subr.bf16.mxu1 %v1971_v8  ;;  %v1243_v8 = vld [vmem:[#allocation11 + $0xd0] sm:$0xff] }
 0x2ad   :  { %v1967_v14 = vcombine.high %v1243_v8, %v1247_v9 }
 0x2af   :  { %1652 = vmatpush1.bf16.msra.mxu1 %v1970_v10  ;;  %v1244_v10 = vld [vmem:[#allocation11 + $0xd8] sm:$0xff] }
 0x2b0   :  { %1653 = vmatprep.subr.bf16.mxu1 %v1979_v17  ;;  %v1251_v17 = vld [vmem:[#allocation11 + $0x110] sm:$0xff] }
 0x2b3   :  { %1654 = vmatpush1.bf16.msra.mxu1 %v1978_v19  ;;  %v1252_v19 = vld [vmem:[#allocation11 + $0x118] sm:$0xff] }
 0x371   :  { %v1084_v26 = vpop.f32.mrb[8].mxu1 }
 0x372   :  { %v1085_v27 = vadd.f32 %v1918_v25, %v1084_v26  ;;  %v2155_v28 = vpop.f32.mrb[9].mxu1  ;;  %v1987_v25 = vcombine.high %v1265_v22, %v1269_v23  ;;  %v1270_v26 = vld [vmem:[#allocation11 + $0x1a8] sm:$0xff] }
 0x373   :  { %v1087_v29 = vpop.f32.mrb[10].mxu1  ;;  %v1988_v28 = vcombine.low %v1266_v24, %v1270_v26 }
 0x374   :  { %v1927_v30 = vmul.f32 -1.442695, %v1085_v27  ;;  %v2156_v31 = vpop.f32.mrb[11].mxu1  ;;  %v1989_v29 = vcombine.high %v1266_v24, %v1270_v26  ;;  %1655 = vmatprep.subr.bf16.mxu1 %v1987_v25  ;;  %v1259_v24 = vld [vmem:[#allocation11 + $0x150] sm:$0xff]  ;;  %v1260_v26 = vld [vmem:[#allocation11 + $0x158] sm:$0xff] }
 0x375   :  { %v1277_v31 = vld [vmem:[#allocation11 + $0x1e0] sm:$0xff]  ;;  %v1263_v25 = vld [vmem:[#allocation11 + $0x170] sm:$0xff] }
 0x376   :  { %2296 = vpow2.f32 %v1927_v30  ;;  %v1273_v30 = vld [vmem:[#allocation11 + $0x1c0] sm:$0xff] }
 0x380   :  { %v2297_v32 = vpop.eup %2296 }
 0x381   :  { %v1093_v33 = vadd.f32 1.0, %v2297_v32  ;;  %v1274_v32 = vld [vmem:[#allocation11 + $0x1c8] sm:$0xff] }
 0x383   :  { %2298 = vrcp.f32 %v1093_v33  ;;  %v1995_v33 = vcombine.high %v1273_v30, %v1277_v31 }
 0x38d   :  { %v2299_v34 = vpop.eup %2298 }
 0x38e   :  { %v1096_v35 = vmul.f32 %v2299_v34, %v1085_v27  ;;  %v1986_v27 = vcombine.low %v1265_v22, %v1269_v23  ;;  %v1278_v34 = vld [vmem:[#allocation11 + $0x1e8] sm:$0xff]  ;;  %v1975_v23 = vcombine.high %v1251_v17, %v1255_v18 }
 0x38f   :  { %v1997_v16 = vcombine.high %v1274_v32, %v1278_v34 }
 0x390   :  { %v1097_v36 = vpack.c.bf16 %v1096_v35, %v1096_v35  ;;  %1656 = vmatpush1.bf16.msra.mxu1 %v1986_v27  ;;  %v1994_v35 = vcombine.low %v1273_v30, %v1277_v31  ;;  %v1264_v27 = vld [vmem:[#allocation11 + $0x178] sm:$0xff]  ;;  %v1983_v30 = vcombine.high %v1259_v24, %v1263_v25 }
 0x391   :  { %1657 = vmatprep.subr.bf16.mxu1 %v1995_v33  ;;  %v1985_v31 = vcombine.high %v1260_v26, %v1264_v27  ;;  %v1271_v33 = vld [vmem:[#allocation11 + $0x1b0] sm:$0xff] }
 0x392   :  { %2174 = vmatmul.mubr.bf16.vlgmr.msra.gmra.mrb[12].mxu0 %v1097_v36  ;;  %v1996_v36 = vcombine.low %v1274_v32, %v1278_v34  ;;  %v1267_v32 = vld [vmem:[#allocation11 + $0x190] sm:$0xff]  ;;  %v1268_v34 = vld [vmem:[#allocation11 + $0x198] sm:$0xff] }
 0x393   :  { %1716 = vmatprep.mubr.bf16.mxu0 %v2478_v0  ;;  %1685 = vmatpush1.bf16.msra.mxu0 %v1940_v42  ;;  %v1942_v42 = vcombine.low %v1219_v37, %v1223_v38  ;;  %v1991_v37 = vcombine.high %v1267_v32, %v1271_v33 }
 0x394   :  { %1686 = vmatprep.subr.bf16.mxu0 %v1949_v51  ;;  %1658 = vmatpush1.bf16.msra.mxu1 %v1994_v35  ;;  %v1272_v35 = vld [vmem:[#allocation11 + $0x1b8] sm:$0xff] }
 0x395   :  { %1725 = vmatprep.subr.bf16.mxu1 %v1943_v40  ;;  %v1993_v38 = vcombine.high %v1268_v34, %v1272_v35  ;;  %v1279_v40 = vld [vmem:[#allocation11 + $0x1f0] sm:$0xff] }
 0x397   :  { %1687 = vmatpush1.bf16.msra.mxu0 %v1948_v50 }
 0x398   :  { %1688 = vmatprep.subr.bf16.mxu0 %v1957_v59 }
 0x39b   :  { %1689 = vmatpush1.bf16.msra.mxu0 %v1956_v58  ;;  %v1232_v58 = vld [vmem:[#allocation11 + $0x78] sm:$0xff] }
 0x39c   :  { %1690 = vmatprep.subr.bf16.mxu0 %v1965_v4  ;;  %v1953_v62 = vcombine.high %v1228_v57, %v1232_v58  ;;  %v1950_v4 = vcombine.low %v1227_v54, %v1231_v56  ;;  %v1952_v5 = vcombine.low %v1228_v57, %v1232_v58 }
 0x39f   :  { %1691 = vmatpush1.bf16.msra.mxu0 %v1964_v3  ;;  %v1240_v3 = vld [vmem:[#allocation11 + $0xb8] sm:$0xff] }
 0x3a0   :  { %1692 = vmatprep.subr.bf16.mxu0 %v1973_v12  ;;  %v1961_v7 = vcombine.high %v1236_v2, %v1240_v3  ;;  %v1958_v12 = vcombine.low %v1235_v63, %v1239_v1  ;;  %v1960_v13 = vcombine.low %v1236_v2, %v1240_v3 }
 0x3a3   :  { %1693 = vmatpush1.bf16.msra.mxu0 %v1972_v11  ;;  %v1248_v11 = vld [vmem:[#allocation11 + $0xf8] sm:$0xff] }
 0x3a4   :  { %1694 = vmatprep.subr.bf16.mxu0 %v1981_v21  ;;  %v1969_v15 = vcombine.high %v1244_v10, %v1248_v11  ;;  %v1966_v21 = vcombine.low %v1243_v8, %v1247_v9  ;;  %v1968_v22 = vcombine.low %v1244_v10, %v1248_v11 }
 0x3a7   :  { %1695 = vmatpush1.bf16.msra.mxu0 %v1980_v20  ;;  %v1256_v20 = vld [vmem:[#allocation11 + $0x138] sm:$0xff] }
 0x3a8   :  { %1696 = vmatprep.subr.bf16.mxu0 %v1989_v29  ;;  %v1976_v29 = vcombine.low %v1252_v19, %v1256_v20 }
 0x3ab   :  { %1697 = vmatpush1.bf16.msra.mxu0 %v1988_v28  ;;  %v1974_v28 = vcombine.low %v1251_v17, %v1255_v18 }
 0x3ac   :  { %1698 = vmatprep.subr.bf16.mxu0 %v1997_v16  ;;  %v1984_v16 = vcombine.low %v1260_v26, %v1264_v27 }
 0x3af   :  { %1699 = vmatpush1.bf16.msra.mxu0 %v1996_v36  ;;  %v1982_v36 = vcombine.low %v1259_v24, %v1263_v25 }
 0x3b0   :  { %1766 = vmatprep.subr.bf16.mxu0 %v1945_v44  ;;  %v1992_v44 = vcombine.low %v1268_v34, %v1272_v35 }
 0x465   :  { %v1203_v46 = vpop.f32.mrb[12].mxu0 }
 0x466   :  { %v1204_v47 = vadd.f32 %v1928_v45, %v1203_v46  ;;  %v2175_v48 = vpop.f32.mrb[13].mxu0  ;;  %v1999_v45 = vcombine.high %v1275_v39, %v1279_v40 }
 0x467   :  { %v1206_v49 = vpop.f32.mrb[14].mxu0 }
 0x468   :  { %v1937_v50 = vmul.f32 -1.442695, %v1204_v47  ;;  %v2176_v51 = vpop.f32.mrb[15].mxu0  ;;  %v1283_v49 = vlaneseq }
 0x46a   :  { %2300 = vpow2.f32 %v1937_v50  ;;  %v1284_v50 = vshrl.u32 %v1283_v49, 7 }
 0x46c   :  { %v1285_v51 = vsub.s32 0, %v1284_v50  ;;  %v1289_v54 = vsub.s32 1, %v1284_v50  ;;  %v1301_v9 = vsub.s32 4, %v1284_v50  ;;  %v1309_v10 = vsub.s32 6, %v1284_v50 }
 0x46d   :  { %v1305_v11 = vsub.s32 5, %v1284_v50 }
 0x474   :  { %v2301_v52 = vpop.eup %2300 }
 0x475   :  { %v1212_v53 = vadd.f32 1.0, %v2301_v52  ;;  %v1293_v52 = vsub.s32 2, %v1284_v50 }
 0x477   :  { %2302 = vrcp.f32 %v1212_v53  ;;  %v1281_v53 = vld [vmem:[%s2722_s12] sm:$0xff]  ;;  %s2481_s12 = smov [#allocation13]  }
 0x478   :  { %v1286_v56 = vrot.slane %v1281_v53, %v1285_v51  ;;  %v1294_v57 = vrot.slane %v1281_v53, %v1293_v52  ;;  %v1290_v58 = vrot.slane %v1281_v53, %v1289_v54  ;;  %s1821_s15 = sshll.u32 %s2481_s12, 4  ;;  %s1822_s15 = int_to_ptr.vmem [resolvable:$true] %s1821_s15 }
 0x479   :  { %s2436_s20 = scalar_lea.vmem %s1822_s15, 1024  ;;  %p2441_p7 = scmp.lt.s32.totalorder %s1822_s15, %s1822_s15 }
 0x47a   :  { %p2437_p6 = scmp.ne.s32.totalorder %s1822_s15, %s2436_s20  ;;  %p2442_p8 = scmp.lt.s32.totalorder %s2436_s20, %s2436_s20 }
 0x47c   :  { %p2443_p9 = por %p2442_p8, %p2441_p7 }
 0x47e   :  { %p2444_p10 = pnand %p2443_p9, %p2437_p6 }
 0x481   :  { %v2303_v55 = vpop.eup %2302 }
 0x482   :  { %v1215_v59 = vmul.f32 %v2303_v55, %v1204_v47  ;;  %v1998_v47 = vcombine.low %v1275_v39, %v1279_v40  ;;  %v1297_v55 = vsub.s32 3, %v1284_v50 }
 0x484   :  { %v2687_v60 = vpack.c.bf16 %v1215_v59, %v1215_v59  ;;  %v1298_v59 = vrot.slane %v1281_v53, %v1297_v55 }
 0x486   :  { %1676 = vmatmul.mubr.bf16.vlgmr.msra.gmra.mrb[12].mxu1 %v2687_v60  ;;  %1717 = vmatmul.mubr.bf16.vlgmr.msra.gmra.mrb[16].mxu0 %v2687_v60 }
 0x487   :  { %1726 = vmatpush1.bf16.msra.mxu1 %v1942_v42  ;;  %1767 = vmatpush1.bf16.msra.mxu0 %v1944_v43  ;;  %v1280_v42 = vld [vmem:[#allocation11 + $0x1f8] sm:$0xff]  ;;  %v1990_v43 = vcombine.low %v1267_v32, %v1271_v33 }
 0x488   :  { %1727 = vmatprep.subr.bf16.mxu1 %v1951_v61  ;;  %1768 = vmatprep.subr.bf16.mxu0 %v1953_v62  ;;  %v2001_v46 = vcombine.high %v1276_v41, %v1280_v42  ;;  %v2000_v48 = vcombine.low %v1276_v41, %v1280_v42 }
 0x489   :  { %1757 = vmatprep.mubr.bf16.mxu1 %v2478_v0  ;;  %1798 = vmatprep.mubr.bf16.mxu0 %v2478_v0  ;;  %v1977_v0 = vcombine.high %v1252_v19, %v1256_v20 }
 0x48b   :  { %1728 = vmatpush1.bf16.msra.mxu1 %v1950_v4  ;;  %1769 = vmatpush1.bf16.msra.mxu0 %v1952_v5 }
 0x48c   :  { %1729 = vmatprep.subr.bf16.mxu1 %v1959_v6  ;;  %1770 = vmatprep.subr.bf16.mxu0 %v1961_v7 }
 0x48f   :  { %1730 = vmatpush1.bf16.msra.mxu1 %v1958_v12  ;;  %1771 = vmatpush1.bf16.msra.mxu0 %v1960_v13  ;;  %v1313_v12 = vsub.s32 7, %v1284_v50  ;;  %v1302_v13 = vrot.slane %v1281_v53, %v1301_v9 }
 0x490   :  { %1731 = vmatprep.subr.bf16.mxu1 %v1967_v14  ;;  %1772 = vmatprep.subr.bf16.mxu0 %v1969_v15  ;;  %v1310_v14 = vrot.slane %v1281_v53, %v1309_v10  ;;  %v1306_v15 = vrot.slane %v1281_v53, %v1305_v11 }
 0x491   :  { %v1314_v17 = vrot.slane %v1281_v53, %v1313_v12 }
 0x493   :  { %1732 = vmatpush1.bf16.msra.mxu1 %v1966_v21  ;;  %1773 = vmatpush1.bf16.msra.mxu0 %v1968_v22 }
 0x494   :  { %1733 = vmatprep.subr.bf16.mxu1 %v1975_v23  ;;  %1774 = vmatprep.subr.bf16.mxu0 %v1977_v0 }
 0x497   :  { %1734 = vmatpush1.bf16.msra.mxu1 %v1974_v28  ;;  %1775 = vmatpush1.bf16.msra.mxu0 %v1976_v29 }
 0x498   :  { %1735 = vmatprep.subr.bf16.mxu1 %v1983_v30  ;;  %1776 = vmatprep.subr.bf16.mxu0 %v1985_v31 }
 0x49b   :  { %1736 = vmatpush1.bf16.msra.mxu1 %v1982_v36  ;;  %1777 = vmatpush1.bf16.msra.mxu0 %v1984_v16 }
 0x49c   :  { %1737 = vmatprep.subr.bf16.mxu1 %v1991_v37  ;;  %1778 = vmatprep.subr.bf16.mxu0 %v1993_v38 }
 0x49f   :  { %1738 = vmatpush1.bf16.msra.mxu1 %v1990_v43  ;;  %1779 = vmatpush1.bf16.msra.mxu0 %v1992_v44 }
 0x4a0   :  { %1739 = vmatprep.subr.bf16.mxu1 %v1999_v45  ;;  %1780 = vmatprep.subr.bf16.mxu0 %v2001_v46 }
 0x4a3   :  { %1740 = vmatpush1.bf16.msra.mxu1 %v1998_v47  ;;  %1781 = vmatpush1.bf16.msra.mxu0 %v2000_v48 }
 0x4a6   :  { %1758 = vmatmul.mubr.bf16.vlgmr.msra.gmra.mrb[16].mxu1 %v2687_v60  ;;  %1799 = vmatmul.mubr.bf16.vlgmr.msra.gmra.mrb[20].mxu0 %v2687_v60 }
 0x559   :  { %v1677_v61 = vpop.f32.mrb[12].mxu1  ;;  %v1718_v62 = vpop.f32.mrb[16].mxu0 }
 0x55a   :  { %v1678_v63 = vadd.f32 %v1677_v61, %v1286_v56  ;;  %v1719_v1 = vadd.f32 %v1718_v62, %v1294_v57  ;;  %v1679_v2 = vpop.f32.mrb[13].mxu1  ;;  %v1720_v60 = vpop.f32.mrb[17].mxu0 }
 0x55b   :  { %v1680_v3 = vadd.f32 %v1679_v2, %v1290_v58  ;;  %v1721_v4 = vadd.f32 %v1720_v60, %v1298_v59  ;;  %v1681_v5 = vpop.f32.mrb[14].mxu1  ;;  %v1722_v6 = vpop.f32.mrb[18].mxu0 }
 0x55c   :  { %1807 = vst [vmem:[#allocation13] sm:$0xff] %v1678_v63  ;;  %1809 = vst [vmem:[#allocation13 + $0x10] sm:$0xff] %v1719_v1  ;;  %v1682_v7 = vpop.f32.mrb[15].mxu1  ;;  %v1723_v8 = vpop.f32.mrb[19].mxu0 }
 0x55d   :  { %1808 = vst [vmem:[#allocation13 + $0x8] sm:$0xff] %v1680_v3  ;;  %1810 = vst [vmem:[#allocation13 + $0x18] sm:$0xff] %v1721_v4 }
 0x579   :  { %v1759_v18 = vpop.f32.mrb[16].mxu1  ;;  %v1800_v19 = vpop.f32.mrb[20].mxu0 }
 0x57a   :  { %v1760_v20 = vadd.f32 %v1759_v18, %v1302_v13  ;;  %v1801_v21 = vadd.f32 %v1800_v19, %v1310_v14  ;;  %v1761_v22 = vpop.f32.mrb[17].mxu1  ;;  %v1802_v23 = vpop.f32.mrb[21].mxu0 }
 0x57b   :  { %v1762_v0 = vadd.f32 %v1761_v22, %v1306_v15  ;;  %v1803_v24 = vadd.f32 %v1802_v23, %v1314_v17  ;;  %v1763_v25 = vpop.f32.mrb[18].mxu1  ;;  %v1804_v26 = vpop.f32.mrb[22].mxu0 }
 0x57c   :  { %1811 = vst [vmem:[#allocation13 + $0x20] sm:$0xff] %v1760_v20  ;;  %1813 = vst [vmem:[#allocation13 + $0x30] sm:$0xff] %v1801_v21  ;;  %v1764_v27 = vpop.f32.mrb[19].mxu1  ;;  %v1805_v28 = vpop.f32.mrb[23].mxu0 }
 0x57d   :  { %1812 = vst [vmem:[#allocation13 + $0x28] sm:$0xff] %v1762_v0  ;;  %1814 = vst [vmem:[#allocation13 + $0x38] sm:$0xff] %v1803_v24 }
 0x57e   :  { %2447 = shalt.err (!%p2444_p10)
}
 0x57f   :  { %s2448_s24 = scalar_lea.hbm %s2723_s13, 1024 }
 0x580   :  { %p2449_p11 = scmp.ne.s32.totalorder %s2723_s13, %s2448_s24  ;;  %p2452_p12 = scmp.lt.u32.totalorder %s2448_s24, %s2723_s13 }
 0x582   :  { %p2454_p13 = pnand %p2452_p12, %p2449_p11 }
 0x584   :  { %2457 = shalt.err (!%p2454_p13)
}
 0x585   :  { %1824 = dma.vmem_to_hbm [thread:$0]  %s1822_s15, 1024, %s2723_s13, [#allocation4]  }
 0x586   :  { %2466 = dma.done.wait [#allocation4], 1024  }
 0x587   :  { %2467 = vsyncadd [#allocation4], 4294966272 }
 0x588   :  { %1828 = vsyncpa [#allocation3], 1 }
 0x589   :  { %1829 = vsyncpa [#allocation6], 1 }
 0x58a   :  { %1830 = vsyncpa [#allocation9], 1 }
 0x58b   :  { %1831 = vsyncpa [#allocation12], 1 }
 0x58c   :  { %1832 = vsyncpa [#allocation4], 1 }

</bundles_post_ra>
